<compile_context>
chip_gen: v5e
topology: v5e:2x2
jax: 0.10.0
libtpu: 0.0.40
codegen_flags: <defaults>
</compile_context>

<pallas_src>
import math
import jax
import jax.numpy as jnp
from jax.experimental import pallas as pl
from jax.experimental.pallas import tpu as pltpu

D_MODEL = 32
N_HEADS = 4
D_FF = 64
EPS = 1e-6


def _recip(x):
    # EUP approximate reciprocal + one Newton-Raphson refinement step:
    # keeps the divide on the (otherwise idle) EUP slot while staying accurate
    # enough for the 1e-4 parity check.
    r = pl.reciprocal(x, approx=True)
    return r * (2.0 - x * r)


def _layer_norm(x, a, b):
    # torch .std() is unbiased (N-1); eps is added to std (not variance).
    mean = jnp.mean(x, axis=-1, keepdims=True)
    var = jnp.sum((x - mean) ** 2, axis=-1, keepdims=True) * (1.0 / (x.shape[-1] - 1))
    return (x - mean) * _recip(jnp.sqrt(var) + EPS) * a + b


def _softmax(s):
    m = jnp.max(s, axis=-1, keepdims=True)
    e = jnp.exp(s - m)
    return e * _recip(jnp.sum(e, axis=-1, keepdims=True))


def encode_layer_kernel(x_ref, mask_ref,
                        ln_ref, wqk_ref, bqk_ref, wvo_ref, battn_ref,
                        w1_ref, b1_ref, w2_ref, b2_ref,
                        o_ref):
    TB, S, D = x_ref.shape
    H = N_HEADS
    dk = D // H
    scale = 1.0 / math.sqrt(dk)
    M = TB * S

    x3 = x_ref[...].astype(jnp.float32)          # (TB, S, D)
    x2 = x3.reshape(M, D)                        # flattened view -> large-M matmuls

    ln = ln_ref[...]
    ln1_a, ln1_b = ln[0:1, :], ln[1:2, :]
    ln2_a, ln2_b = ln[2:3, :], ln[3:4, :]

    # Mask bias: select + broadcast once, reused by every head (no re-broadcast
    # inside the loop since JAX does not CSE broadcast_in_dim).
    bias = jnp.broadcast_to(
        jnp.where(mask_ref[...] > 0, 0.0, -1e9), (TB, S, S))     # (TB, S, S)

    # ---- Sublayer 0: x + SelfAttn(LN1(x))   (dropout = identity in eval)
    h1 = _layer_norm(x2, ln1_a, ln1_b)                                        # (M, D)
    qk = jnp.dot(h1, wqk_ref[...], preferred_element_type=jnp.float32) + bqk_ref[...]
    q3 = qk[:, :D].reshape(TB, S, D)
    k3 = qk[:, D:].reshape(TB, S, D)

    attn = jnp.zeros((TB, S, D), jnp.float32)
    for hd in range(H):                                   # static unroll, H = 4
        sl = slice(hd * dk, (hd + 1) * dk)
        s = jnp.einsum('bqd,bkd->bqk', q3[:, :, sl], k3[:, :, sl],
                       preferred_element_type=jnp.float32) * scale + bias
        p = _softmax(s)                                   # (TB, S, S)
        # Fused value/output projection: one lane-dense (M,D)x(D,D) matmul/head.
        vo = jnp.dot(h1, wvo_ref[hd], preferred_element_type=jnp.float32)     # (M, D)
        attn = attn + jnp.einsum('bqk,bkd->bqd', p, vo.reshape(TB, S, D),
                                 preferred_element_type=jnp.float32)
    x2 = x2 + attn.reshape(M, D) + battn_ref[...]

    # ---- Sublayer 1: x + FFN(LN2(x))   (dropout = identity in eval)
    h2 = _layer_norm(x2, ln2_a, ln2_b)
    f = jnp.dot(h2, w1_ref[...], preferred_element_type=jnp.float32) + b1_ref[...]
    f = jnp.maximum(f, 0.0)
    f = jnp.dot(f, w2_ref[...], preferred_element_type=jnp.float32) + b2_ref[...]

    o_ref[...] = (x2 + f).reshape(TB, S, D).astype(o_ref.dtype)


def _prepare_params(params):
    """Fuse the 16 raw parameter arrays into 9 kernel inputs (host-side)."""
    (ln1_a, ln1_b, wq, bq, wk, bk, wv, bv, wo, bo,
     ln2_a, ln2_b, w1, b1, w2, b2) = params
    D, H = D_MODEL, N_HEADS
    dk = D // H
    ln_ab = jnp.concatenate([ln1_a, ln1_b, ln2_a, ln2_b], axis=0)          # (4, D)
    w_qk = jnp.concatenate([wq, wk], axis=1)                               # (D, 2D)
    b_qk = jnp.concatenate([bq, bk], axis=1)                               # (1, 2D)
    # Per-head fused value->output projection: W_vo[h] = Wv[:, h] @ Wo[h, :].
    w_vo = jnp.einsum('dhk,hke->hde',
                      wv.reshape(D, H, dk), wo.reshape(H, dk, D))          # (H, D, D)
    # Softmax rows sum to 1 => p @ (1 * bv) @ Wo == bv @ Wo; fold into one bias.
    b_attn = bv @ wo + bo                                                  # (1, D)
    return [ln_ab, w_qk, b_qk, w_vo, b_attn, w1, b1, w2, b2]


def encode_layer(x, mask, params, *, block_b=None):
    """x: (B, S, D) f32; mask: (B, 1, S), 1.0 = attend / 0.0 = masked key."""
    B, S, D = x.shape
    if block_b is None:
        # Target a few hundred rows (TB*S) per grid step, but keep >= 2 grid
        # steps when B allows it so the "parallel" axis can shard across the
        # two TensorCores on v7x. (When scaling S/D up, re-budget block_b for
        # v7x's 64 MiB VMEM.)
        block_b = max(1, min(-(-B // 2), 512 // S))
    nb = -(-B // block_b)
    b_pad = nb * block_b
    if b_pad != B:
        pad = b_pad - B
        x = jnp.concatenate([x, jnp.zeros((pad, S, D), x.dtype)], axis=0)
        mask = jnp.concatenate([mask, jnp.ones((pad, 1, S), mask.dtype)], axis=0)

    fused = _prepare_params(params)

    def full_spec(p):
        return pl.BlockSpec(p.shape, lambda b, _n=p.ndim: (0,) * _n)

    in_specs = [
        pl.BlockSpec((block_b, S, D), lambda b: (b, 0, 0)),    # x block
        pl.BlockSpec((block_b, 1, S), lambda b: (b, 0, 0)),    # mask block
    ] + [full_spec(p) for p in fused]

    out = pl.pallas_call(
        encode_layer_kernel,
        out_shape=jax.ShapeDtypeStruct((b_pad, S, D), x.dtype),
        grid=(nb,),
        in_specs=in_specs,
        out_specs=pl.BlockSpec((block_b, S, D), lambda b: (b, 0, 0)),
        compiler_params=pltpu.CompilerParams(
            dimension_semantics=("parallel",)),
    )(x, mask, *fused)
    return out[:B]


def init_params(key):
    ks = jax.random.split(key, 6)

    def linear(k, fan_in, fan_out):
        bound = 1.0 / math.sqrt(fan_in)
        kw, kb = jax.random.split(k)
        w = jax.random.uniform(kw, (fan_in, fan_out), jnp.float32, -bound, bound)
        b = jax.random.uniform(kb, (1, fan_out), jnp.float32, -bound, bound)
        return w, b

    wq, bq = linear(ks[0], D_MODEL, D_MODEL)
    wk, bk = linear(ks[1], D_MODEL, D_MODEL)
    wv, bv = linear(ks[2], D_MODEL, D_MODEL)
    wo, bo = linear(ks[3], D_MODEL, D_MODEL)
    w1, b1 = linear(ks[4], D_MODEL, D_FF)
    w2, b2 = linear(ks[5], D_FF, D_MODEL)
    ln1_a = jnp.ones((1, D_MODEL), jnp.float32)
    ln1_b = jnp.zeros((1, D_MODEL), jnp.float32)
    ln2_a = jnp.ones((1, D_MODEL), jnp.float32)
    ln2_b = jnp.zeros((1, D_MODEL), jnp.float32)
    return [ln1_a, ln1_b, wq, bq, wk, bk, wv, bv, wo, bo,
            ln2_a, ln2_b, w1, b1, w2, b2]


def encode_layer_ref(x, mask, params):
    """Pure-JAX reference mirroring the PyTorch EncodeLayer forward (eval)."""
    (ln1_a, ln1_b, wq, bq, wk, bk, wv, bv, wo, bo,
     ln2_a, ln2_b, w1, b1, w2, b2) = params
    B, S, D = x.shape
    H, dk = N_HEADS, D // N_HEADS

    def ln(t, a, b):
        mean = t.mean(-1, keepdims=True)
        std = jnp.sqrt(((t - mean) ** 2).sum(-1, keepdims=True) / (t.shape[-1] - 1))
        return a * (t - mean) / (std + EPS) + b

    h = ln(x, ln1_a, ln1_b)
    q = (h @ wq + bq).reshape(B, S, H, dk).transpose(0, 2, 1, 3)
    k = (h @ wk + bk).reshape(B, S, H, dk).transpose(0, 2, 1, 3)
    v = (h @ wv + bv).reshape(B, S, H, dk).transpose(0, 2, 1, 3)
    s = jnp.einsum('bhqd,bhkd->bhqk', q, k) / math.sqrt(dk)
    s = jnp.where(mask[:, None, :, :] > 0, s, -1e9)
    p = jax.nn.softmax(s, axis=-1)
    o = jnp.einsum('bhqk,bhkd->bhqd', p, v).transpose(0, 2, 1, 3).reshape(B, S, D)
    x = x + o @ wo + bo
    h2 = ln(x, ln2_a, ln2_b)
    f = jnp.maximum(h2 @ w1 + b1, 0.0) @ w2 + b2
    return x + f


if __name__ == "__main__":
    B, S = 4, 8
    key = jax.random.PRNGKey(0)
    kx, kp = jax.random.split(key)

    x = jax.random.normal(kx, (B, S, D_MODEL), jnp.float32)
    lens = jnp.array([S, 5, 8, 3])
    mask = (jnp.arange(S)[None, :] < lens[:, None]).astype(jnp.float32)[:, None, :]
    params = init_params(kp)

    out = encode_layer(x, mask, params)
    out = jax.block_until_ready(out)

    ref = encode_layer_ref(x, mask, params)
    assert out.shape == (B, S, D_MODEL)
    assert jnp.allclose(out, ref, atol=1e-4, rtol=1e-4), "mismatch vs JAX reference"
    print("KERNEL_OK")
</pallas_src>

<mosaic_0001>
module attributes {stable_mosaic.version = 11 : i64} {
  func.func @encode_layer_kernel(%arg0: i32, %arg1: memref<2x8x32xf32, #tpu.memory_space<vmem>>, %arg2: memref<2x1x8xf32, #tpu.memory_space<vmem>>, %arg3: memref<4x32xf32, #tpu.memory_space<vmem>>, %arg4: memref<32x64xf32, #tpu.memory_space<vmem>>, %arg5: memref<1x64xf32, #tpu.memory_space<vmem>>, %arg6: memref<4x32x32xf32, #tpu.memory_space<vmem>>, %arg7: memref<1x32xf32, #tpu.memory_space<vmem>>, %arg8: memref<32x64xf32, #tpu.memory_space<vmem>>, %arg9: memref<1x64xf32, #tpu.memory_space<vmem>>, %arg10: memref<64x32xf32, #tpu.memory_space<vmem>>, %arg11: memref<1x32xf32, #tpu.memory_space<vmem>>, %arg12: memref<2x8x32xf32, #tpu.memory_space<vmem>>) attributes {dimension_semantics = [#tpu.dimension_semantics<parallel>], iteration_bounds = array<i64: 2>, scalar_prefetch = 0 : i64, scratch_operands = 0 : i64, tpu.core_type = #tpu.core_type<tc>, window_params = [{transform_indices = @transform_0, window_bounds = array<i64: 2, 8, 32>}, {transform_indices = @transform_1, window_bounds = array<i64: 2, 1, 8>}, {pipeline_mode = #tpu.pipeline_mode<synchronous>, transform_indices = @transform_2, window_bounds = array<i64: 4, 32>}, {pipeline_mode = #tpu.pipeline_mode<synchronous>, transform_indices = @transform_3, window_bounds = array<i64: 32, 64>}, {pipeline_mode = #tpu.pipeline_mode<synchronous>, transform_indices = @transform_4, window_bounds = array<i64: 1, 64>}, {pipeline_mode = #tpu.pipeline_mode<synchronous>, transform_indices = @transform_5, window_bounds = array<i64: 4, 32, 32>}, {pipeline_mode = #tpu.pipeline_mode<synchronous>, transform_indices = @transform_6, window_bounds = array<i64: 1, 32>}, {pipeline_mode = #tpu.pipeline_mode<synchronous>, transform_indices = @transform_7, window_bounds = array<i64: 32, 64>}, {pipeline_mode = #tpu.pipeline_mode<synchronous>, transform_indices = @transform_8, window_bounds = array<i64: 1, 64>}, {pipeline_mode = #tpu.pipeline_mode<synchronous>, transform_indices = @transform_9, window_bounds = array<i64: 64, 32>}, {pipeline_mode = #tpu.pipeline_mode<synchronous>, transform_indices = @transform_10, window_bounds = array<i64: 1, 32>}, {transform_indices = @transform_11, window_bounds = array<i64: 2, 8, 32>}]} {
    %c0 = arith.constant 0 : index
    %c0_0 = arith.constant 0 : index
    %c0_1 = arith.constant 0 : index
    %0 = vector.load %arg1[%c0, %c0_0, %c0_1] : memref<2x8x32xf32, #tpu.memory_space<vmem>>, vector<2x8x32xf32>
    %1 = vector.shape_cast %0 : vector<2x8x32xf32> to vector<16x32xf32>
    %c0_2 = arith.constant 0 : index
    %c0_3 = arith.constant 0 : index
    %2 = vector.load %arg3[%c0_2, %c0_3] : memref<4x32xf32, #tpu.memory_space<vmem>>, vector<4x32xf32>
    %3 = vector.extract_strided_slice %2 {offsets = [0, 0], sizes = [1, 32], strides = [1, 1]} : vector<4x32xf32> to vector<1x32xf32>
    %4 = vector.extract_strided_slice %2 {offsets = [1, 0], sizes = [1, 32], strides = [1, 1]} : vector<4x32xf32> to vector<1x32xf32>
    %5 = vector.extract_strided_slice %2 {offsets = [2, 0], sizes = [1, 32], strides = [1, 1]} : vector<4x32xf32> to vector<1x32xf32>
    %6 = vector.extract_strided_slice %2 {offsets = [3, 0], sizes = [1, 32], strides = [1, 1]} : vector<4x32xf32> to vector<1x32xf32>
    %c0_4 = arith.constant 0 : index
    %c0_5 = arith.constant 0 : index
    %c0_6 = arith.constant 0 : index
    %7 = vector.load %arg2[%c0_4, %c0_5, %c0_6] : memref<2x1x8xf32, #tpu.memory_space<vmem>>, vector<2x1x8xf32>
    %cst = arith.constant 0.000000e+00 : f32
    %8 = vector.broadcast %cst : f32 to vector<2x1x8xf32>
    %9 = arith.cmpf ogt, %7, %8 : vector<2x1x8xf32>
    %cst_7 = arith.constant 0.000000e+00 : f32
    %cst_8 = arith.constant -1.000000e+09 : f32
    %10 = vector.broadcast %cst_7 : f32 to vector<2x1x8xf32>
    %11 = vector.broadcast %cst_8 : f32 to vector<2x1x8xf32>
    %12 = arith.select %9, %10, %11 : vector<2x1x8xi1>, vector<2x1x8xf32>
    %13 = vector.shape_cast %12 : vector<2x1x8xf32> to vector<2x1x8xf32>
    %14 = vector.broadcast %13 : vector<2x1x8xf32> to vector<2x8x8xf32>
    %cst_9 = arith.constant dense<0.000000e+00> : vector<16xf32>
    %15 = vector.multi_reduction <add>, %1, %cst_9 [1] : vector<16x32xf32> to vector<16xf32>
    %16 = vector.shape_cast %15 : vector<16xf32> to vector<16x1xf32>
    %cst_10 = arith.constant 3.200000e+01 : f32
    %17 = vector.broadcast %cst_10 : f32 to vector<16x1xf32>
    %18 = arith.divf %16, %17 : vector<16x1xf32>
    %19 = vector.broadcast %18 : vector<16x1xf32> to vector<16x32xf32>
    %20 = arith.subf %1, %19 : vector<16x32xf32>
    %21 = arith.mulf %20, %20 : vector<16x32xf32>
    %cst_11 = arith.constant dense<0.000000e+00> : vector<16xf32>
    %22 = vector.multi_reduction <add>, %21, %cst_11 [1] : vector<16x32xf32> to vector<16xf32>
    %23 = vector.shape_cast %22 : vector<16xf32> to vector<16x1xf32>
    %cst_12 = arith.constant 0.0322580636 : f32
    %24 = vector.broadcast %cst_12 : f32 to vector<16x1xf32>
    %25 = arith.mulf %23, %24 : vector<16x1xf32>
    %26 = vector.broadcast %18 : vector<16x1xf32> to vector<16x32xf32>
    %27 = arith.subf %1, %26 : vector<16x32xf32>
    %28 = math.sqrt %25 : vector<16x1xf32>
    %cst_13 = arith.constant 9.99999997E-7 : f32
    %29 = vector.broadcast %cst_13 : f32 to vector<16x1xf32>
    %30 = arith.addf %28, %29 : vector<16x1xf32>
    %31 = tpu.reciprocal %30 {approx = true} : vector<16x1xf32> -> vector<16x1xf32>
    %32 = arith.mulf %30, %31 : vector<16x1xf32>
    %cst_14 = arith.constant 2.000000e+00 : f32
    %33 = vector.broadcast %cst_14 : f32 to vector<16x1xf32>
    %34 = arith.subf %33, %32 : vector<16x1xf32>
    %35 = arith.mulf %31, %34 : vector<16x1xf32>
    %36 = vector.broadcast %35 : vector<16x1xf32> to vector<16x32xf32>
    %37 = arith.mulf %27, %36 : vector<16x32xf32>
    %38 = vector.broadcast %3 : vector<1x32xf32> to vector<16x32xf32>
    %39 = arith.mulf %37, %38 : vector<16x32xf32>
    %40 = vector.broadcast %4 : vector<1x32xf32> to vector<16x32xf32>
    %41 = arith.addf %39, %40 : vector<16x32xf32>
    %c0_15 = arith.constant 0 : index
    %c0_16 = arith.constant 0 : index
    %42 = vector.load %arg4[%c0_15, %c0_16] : memref<32x64xf32, #tpu.memory_space<vmem>>, vector<32x64xf32>
    %cst_17 = arith.constant dense<0.000000e+00> : vector<16x64xf32>
    %43 = tpu.matmul %41, %42, %cst_17 {dimension_numbers = #tpu.dot_dimension_numbers<[1], [0], [0], [1], [0, 0, 1, 1], [], []>} : vector<16x32xf32>, vector<32x64xf32>, vector<16x64xf32> -> vector<16x64xf32>
    %c0_18 = arith.constant 0 : index
    %c0_19 = arith.constant 0 : index
    %44 = vector.load %arg5[%c0_18, %c0_19] : memref<1x64xf32, #tpu.memory_space<vmem>>, vector<1x64xf32>
    %45 = vector.broadcast %44 : vector<1x64xf32> to vector<16x64xf32>
    %46 = arith.addf %43, %45 : vector<16x64xf32>
    %47 = vector.extract_strided_slice %46 {offsets = [0, 0], sizes = [16, 32], strides = [1, 1]} : vector<16x64xf32> to vector<16x32xf32>
    %48 = vector.shape_cast %47 : vector<16x32xf32> to vector<2x8x32xf32>
    %49 = vector.extract_strided_slice %46 {offsets = [0, 32], sizes = [16, 32], strides = [1, 1]} : vector<16x64xf32> to vector<16x32xf32>
    %50 = vector.shape_cast %49 : vector<16x32xf32> to vector<2x8x32xf32>
    %cst_20 = arith.constant 0.000000e+00 : f32
    %51 = vector.broadcast %cst_20 : f32 to vector<2x8x32xf32>
    %52 = vector.extract_strided_slice %48 {offsets = [0, 0, 0], sizes = [2, 8, 8], strides = [1, 1, 1]} : vector<2x8x32xf32> to vector<2x8x8xf32>
    %53 = vector.extract_strided_slice %50 {offsets = [0, 0, 0], sizes = [2, 8, 8], strides = [1, 1, 1]} : vector<2x8x32xf32> to vector<2x8x8xf32>
    "tpu.trace_start"() <{level = 10 : i32, message = "bqd,bkd->bqk"}> : () -> ()
    %cst_21 = arith.constant dense<0.000000e+00> : vector<2x8x8xf32>
    %54 = tpu.matmul %52, %53, %cst_21 {dimension_numbers = #tpu.dot_dimension_numbers<[2], [2], [1], [1], [0, 0, 0, 1, 1, 1], [0], [0]>} : vector<2x8x8xf32>, vector<2x8x8xf32>, vector<2x8x8xf32> -> vector<2x8x8xf32>
    "tpu.trace_stop"() : () -> ()
    %cst_22 = arith.constant 0.353553385 : f32
    %55 = vector.broadcast %cst_22 : f32 to vector<2x8x8xf32>
    %56 = arith.mulf %54, %55 : vector<2x8x8xf32>
    %57 = arith.addf %56, %14 : vector<2x8x8xf32>
    %cst_23 = arith.constant dense<0xFF800000> : vector<2x8xf32>
    %58 = vector.multi_reduction <maximumf>, %57, %cst_23 [2] : vector<2x8x8xf32> to vector<2x8xf32>
    %59 = vector.shape_cast %58 : vector<2x8xf32> to vector<2x8x1xf32>
    %60 = vector.broadcast %59 : vector<2x8x1xf32> to vector<2x8x8xf32>
    %61 = arith.subf %57, %60 : vector<2x8x8xf32>
    %62 = math.exp %61 : vector<2x8x8xf32>
    %cst_24 = arith.constant dense<0.000000e+00> : vector<2x8xf32>
    %63 = vector.multi_reduction <add>, %62, %cst_24 [2] : vector<2x8x8xf32> to vector<2x8xf32>
    %64 = vector.shape_cast %63 : vector<2x8xf32> to vector<2x8x1xf32>
    %65 = tpu.reciprocal %64 {approx = true} : vector<2x8x1xf32> -> vector<2x8x1xf32>
    %66 = arith.mulf %64, %65 : vector<2x8x1xf32>
    %cst_25 = arith.constant 2.000000e+00 : f32
    %67 = vector.broadcast %cst_25 : f32 to vector<2x8x1xf32>
    %68 = arith.subf %67, %66 : vector<2x8x1xf32>
    %69 = arith.mulf %65, %68 : vector<2x8x1xf32>
    %70 = vector.broadcast %69 : vector<2x8x1xf32> to vector<2x8x8xf32>
    %71 = arith.mulf %62, %70 : vector<2x8x8xf32>
    %c0_26 = arith.constant 0 : index
    %c0_27 = arith.constant 0 : index
    %c0_28 = arith.constant 0 : index
    %72 = vector.load %arg6[%c0_26, %c0_27, %c0_28] : memref<4x32x32xf32, #tpu.memory_space<vmem>>, vector<1x32x32xf32>
    %73 = vector.shape_cast %72 : vector<1x32x32xf32> to vector<32x32xf32>
    %cst_29 = arith.constant dense<0.000000e+00> : vector<16x32xf32>
    %74 = tpu.matmul %41, %73, %cst_29 {dimension_numbers = #tpu.dot_dimension_numbers<[1], [0], [0], [1], [0, 0, 1, 1], [], []>} : vector<16x32xf32>, vector<32x32xf32>, vector<16x32xf32> -> vector<16x32xf32>
    %75 = vector.shape_cast %74 : vector<16x32xf32> to vector<2x8x32xf32>
    "tpu.trace_start"() <{level = 10 : i32, message = "bqk,bkd->bqd"}> : () -> ()
    %cst_30 = arith.constant dense<0.000000e+00> : vector<2x8x32xf32>
    %76 = tpu.matmul %71, %75, %cst_30 {dimension_numbers = #tpu.dot_dimension_numbers<[2], [1], [1], [2], [0, 0, 0, 1, 1, 2], [0], [0]>} : vector<2x8x8xf32>, vector<2x8x32xf32>, vector<2x8x32xf32> -> vector<2x8x32xf32>
    "tpu.trace_stop"() : () -> ()
    %77 = arith.addf %51, %76 : vector<2x8x32xf32>
    %78 = vector.extract_strided_slice %48 {offsets = [0, 0, 8], sizes = [2, 8, 8], strides = [1, 1, 1]} : vector<2x8x32xf32> to vector<2x8x8xf32>
    %79 = vector.extract_strided_slice %50 {offsets = [0, 0, 8], sizes = [2, 8, 8], strides = [1, 1, 1]} : vector<2x8x32xf32> to vector<2x8x8xf32>
    "tpu.trace_start"() <{level = 10 : i32, message = "bqd,bkd->bqk"}> : () -> ()
    %cst_31 = arith.constant dense<0.000000e+00> : vector<2x8x8xf32>
    %80 = tpu.matmul %78, %79, %cst_31 {dimension_numbers = #tpu.dot_dimension_numbers<[2], [2], [1], [1], [0, 0, 0, 1, 1, 1], [0], [0]>} : vector<2x8x8xf32>, vector<2x8x8xf32>, vector<2x8x8xf32> -> vector<2x8x8xf32>
    "tpu.trace_stop"() : () -> ()
    %cst_32 = arith.constant 0.353553385 : f32
    %81 = vector.broadcast %cst_32 : f32 to vector<2x8x8xf32>
    %82 = arith.mulf %80, %81 : vector<2x8x8xf32>
    %83 = arith.addf %82, %14 : vector<2x8x8xf32>
    %cst_33 = arith.constant dense<0xFF800000> : vector<2x8xf32>
    %84 = vector.multi_reduction <maximumf>, %83, %cst_33 [2] : vector<2x8x8xf32> to vector<2x8xf32>
    %85 = vector.shape_cast %84 : vector<2x8xf32> to vector<2x8x1xf32>
    %86 = vector.broadcast %85 : vector<2x8x1xf32> to vector<2x8x8xf32>
    %87 = arith.subf %83, %86 : vector<2x8x8xf32>
    %88 = math.exp %87 : vector<2x8x8xf32>
    %cst_34 = arith.constant dense<0.000000e+00> : vector<2x8xf32>
    %89 = vector.multi_reduction <add>, %88, %cst_34 [2] : vector<2x8x8xf32> to vector<2x8xf32>
    %90 = vector.shape_cast %89 : vector<2x8xf32> to vector<2x8x1xf32>
    %91 = tpu.reciprocal %90 {approx = true} : vector<2x8x1xf32> -> vector<2x8x1xf32>
    %92 = arith.mulf %90, %91 : vector<2x8x1xf32>
    %cst_35 = arith.constant 2.000000e+00 : f32
    %93 = vector.broadcast %cst_35 : f32 to vector<2x8x1xf32>
    %94 = arith.subf %93, %92 : vector<2x8x1xf32>
    %95 = arith.mulf %91, %94 : vector<2x8x1xf32>
    %96 = vector.broadcast %95 : vector<2x8x1xf32> to vector<2x8x8xf32>
    %97 = arith.mulf %88, %96 : vector<2x8x8xf32>
    %c1 = arith.constant 1 : index
    %c0_36 = arith.constant 0 : index
    %c0_37 = arith.constant 0 : index
    %98 = vector.load %arg6[%c1, %c0_36, %c0_37] : memref<4x32x32xf32, #tpu.memory_space<vmem>>, vector<1x32x32xf32>
    %99 = vector.shape_cast %98 : vector<1x32x32xf32> to vector<32x32xf32>
    %cst_38 = arith.constant dense<0.000000e+00> : vector<16x32xf32>
    %100 = tpu.matmul %41, %99, %cst_38 {dimension_numbers = #tpu.dot_dimension_numbers<[1], [0], [0], [1], [0, 0, 1, 1], [], []>} : vector<16x32xf32>, vector<32x32xf32>, vector<16x32xf32> -> vector<16x32xf32>
    %101 = vector.shape_cast %100 : vector<16x32xf32> to vector<2x8x32xf32>
    "tpu.trace_start"() <{level = 10 : i32, message = "bqk,bkd->bqd"}> : () -> ()
    %cst_39 = arith.constant dense<0.000000e+00> : vector<2x8x32xf32>
    %102 = tpu.matmul %97, %101, %cst_39 {dimension_numbers = #tpu.dot_dimension_numbers<[2], [1], [1], [2], [0, 0, 0, 1, 1, 2], [0], [0]>} : vector<2x8x8xf32>, vector<2x8x32xf32>, vector<2x8x32xf32> -> vector<2x8x32xf32>
    "tpu.trace_stop"() : () -> ()
    %103 = arith.addf %77, %102 : vector<2x8x32xf32>
    %104 = vector.extract_strided_slice %48 {offsets = [0, 0, 16], sizes = [2, 8, 8], strides = [1, 1, 1]} : vector<2x8x32xf32> to vector<2x8x8xf32>
    %105 = vector.extract_strided_slice %50 {offsets = [0, 0, 16], sizes = [2, 8, 8], strides = [1, 1, 1]} : vector<2x8x32xf32> to vector<2x8x8xf32>
    "tpu.trace_start"() <{level = 10 : i32, message = "bqd,bkd->bqk"}> : () -> ()
    %cst_40 = arith.constant dense<0.000000e+00> : vector<2x8x8xf32>
    %106 = tpu.matmul %104, %105, %cst_40 {dimension_numbers = #tpu.dot_dimension_numbers<[2], [2], [1], [1], [0, 0, 0, 1, 1, 1], [0], [0]>} : vector<2x8x8xf32>, vector<2x8x8xf32>, vector<2x8x8xf32> -> vector<2x8x8xf32>
    "tpu.trace_stop"() : () -> ()
    %cst_41 = arith.constant 0.353553385 : f32
    %107 = vector.broadcast %cst_41 : f32 to vector<2x8x8xf32>
    %108 = arith.mulf %106, %107 : vector<2x8x8xf32>
    %109 = arith.addf %108, %14 : vector<2x8x8xf32>
    %cst_42 = arith.constant dense<0xFF800000> : vector<2x8xf32>
    %110 = vector.multi_reduction <maximumf>, %109, %cst_42 [2] : vector<2x8x8xf32> to vector<2x8xf32>
    %111 = vector.shape_cast %110 : vector<2x8xf32> to vector<2x8x1xf32>
    %112 = vector.broadcast %111 : vector<2x8x1xf32> to vector<2x8x8xf32>
    %113 = arith.subf %109, %112 : vector<2x8x8xf32>
    %114 = math.exp %113 : vector<2x8x8xf32>
    %cst_43 = arith.constant dense<0.000000e+00> : vector<2x8xf32>
    %115 = vector.multi_reduction <add>, %114, %cst_43 [2] : vector<2x8x8xf32> to vector<2x8xf32>
    %116 = vector.shape_cast %115 : vector<2x8xf32> to vector<2x8x1xf32>
    %117 = tpu.reciprocal %116 {approx = true} : vector<2x8x1xf32> -> vector<2x8x1xf32>
    %118 = arith.mulf %116, %117 : vector<2x8x1xf32>
    %cst_44 = arith.constant 2.000000e+00 : f32
    %119 = vector.broadcast %cst_44 : f32 to vector<2x8x1xf32>
    %120 = arith.subf %119, %118 : vector<2x8x1xf32>
    %121 = arith.mulf %117, %120 : vector<2x8x1xf32>
    %122 = vector.broadcast %121 : vector<2x8x1xf32> to vector<2x8x8xf32>
    %123 = arith.mulf %114, %122 : vector<2x8x8xf32>
    %c2 = arith.constant 2 : index
    %c0_45 = arith.constant 0 : index
    %c0_46 = arith.constant 0 : index
    %124 = vector.load %arg6[%c2, %c0_45, %c0_46] : memref<4x32x32xf32, #tpu.memory_space<vmem>>, vector<1x32x32xf32>
    %125 = vector.shape_cast %124 : vector<1x32x32xf32> to vector<32x32xf32>
    %cst_47 = arith.constant dense<0.000000e+00> : vector<16x32xf32>
    %126 = tpu.matmul %41, %125, %cst_47 {dimension_numbers = #tpu.dot_dimension_numbers<[1], [0], [0], [1], [0, 0, 1, 1], [], []>} : vector<16x32xf32>, vector<32x32xf32>, vector<16x32xf32> -> vector<16x32xf32>
    %127 = vector.shape_cast %126 : vector<16x32xf32> to vector<2x8x32xf32>
    "tpu.trace_start"() <{level = 10 : i32, message = "bqk,bkd->bqd"}> : () -> ()
    %cst_48 = arith.constant dense<0.000000e+00> : vector<2x8x32xf32>
    %128 = tpu.matmul %123, %127, %cst_48 {dimension_numbers = #tpu.dot_dimension_numbers<[2], [1], [1], [2], [0, 0, 0, 1, 1, 2], [0], [0]>} : vector<2x8x8xf32>, vector<2x8x32xf32>, vector<2x8x32xf32> -> vector<2x8x32xf32>
    "tpu.trace_stop"() : () -> ()
    %129 = arith.addf %103, %128 : vector<2x8x32xf32>
    %130 = vector.extract_strided_slice %48 {offsets = [0, 0, 24], sizes = [2, 8, 8], strides = [1, 1, 1]} : vector<2x8x32xf32> to vector<2x8x8xf32>
    %131 = vector.extract_strided_slice %50 {offsets = [0, 0, 24], sizes = [2, 8, 8], strides = [1, 1, 1]} : vector<2x8x32xf32> to vector<2x8x8xf32>
    "tpu.trace_start"() <{level = 10 : i32, message = "bqd,bkd->bqk"}> : () -> ()
    %cst_49 = arith.constant dense<0.000000e+00> : vector<2x8x8xf32>
    %132 = tpu.matmul %130, %131, %cst_49 {dimension_numbers = #tpu.dot_dimension_numbers<[2], [2], [1], [1], [0, 0, 0, 1, 1, 1], [0], [0]>} : vector<2x8x8xf32>, vector<2x8x8xf32>, vector<2x8x8xf32> -> vector<2x8x8xf32>
    "tpu.trace_stop"() : () -> ()
    %cst_50 = arith.constant 0.353553385 : f32
    %133 = vector.broadcast %cst_50 : f32 to vector<2x8x8xf32>
    %134 = arith.mulf %132, %133 : vector<2x8x8xf32>
    %135 = arith.addf %134, %14 : vector<2x8x8xf32>
    %cst_51 = arith.constant dense<0xFF800000> : vector<2x8xf32>
    %136 = vector.multi_reduction <maximumf>, %135, %cst_51 [2] : vector<2x8x8xf32> to vector<2x8xf32>
    %137 = vector.shape_cast %136 : vector<2x8xf32> to vector<2x8x1xf32>
    %138 = vector.broadcast %137 : vector<2x8x1xf32> to vector<2x8x8xf32>
    %139 = arith.subf %135, %138 : vector<2x8x8xf32>
    %140 = math.exp %139 : vector<2x8x8xf32>
    %cst_52 = arith.constant dense<0.000000e+00> : vector<2x8xf32>
    %141 = vector.multi_reduction <add>, %140, %cst_52 [2] : vector<2x8x8xf32> to vector<2x8xf32>
    %142 = vector.shape_cast %141 : vector<2x8xf32> to vector<2x8x1xf32>
    %143 = tpu.reciprocal %142 {approx = true} : vector<2x8x1xf32> -> vector<2x8x1xf32>
    %144 = arith.mulf %142, %143 : vector<2x8x1xf32>
    %cst_53 = arith.constant 2.000000e+00 : f32
    %145 = vector.broadcast %cst_53 : f32 to vector<2x8x1xf32>
    %146 = arith.subf %145, %144 : vector<2x8x1xf32>
    %147 = arith.mulf %143, %146 : vector<2x8x1xf32>
    %148 = vector.broadcast %147 : vector<2x8x1xf32> to vector<2x8x8xf32>
    %149 = arith.mulf %140, %148 : vector<2x8x8xf32>
    %c3 = arith.constant 3 : index
    %c0_54 = arith.constant 0 : index
    %c0_55 = arith.constant 0 : index
    %150 = vector.load %arg6[%c3, %c0_54, %c0_55] : memref<4x32x32xf32, #tpu.memory_space<vmem>>, vector<1x32x32xf32>
    %151 = vector.shape_cast %150 : vector<1x32x32xf32> to vector<32x32xf32>
    %cst_56 = arith.constant dense<0.000000e+00> : vector<16x32xf32>
    %152 = tpu.matmul %41, %151, %cst_56 {dimension_numbers = #tpu.dot_dimension_numbers<[1], [0], [0], [1], [0, 0, 1, 1], [], []>} : vector<16x32xf32>, vector<32x32xf32>, vector<16x32xf32> -> vector<16x32xf32>
    %153 = vector.shape_cast %152 : vector<16x32xf32> to vector<2x8x32xf32>
    "tpu.trace_start"() <{level = 10 : i32, message = "bqk,bkd->bqd"}> : () -> ()
    %cst_57 = arith.constant dense<0.000000e+00> : vector<2x8x32xf32>
    %154 = tpu.matmul %149, %153, %cst_57 {dimension_numbers = #tpu.dot_dimension_numbers<[2], [1], [1], [2], [0, 0, 0, 1, 1, 2], [0], [0]>} : vector<2x8x8xf32>, vector<2x8x32xf32>, vector<2x8x32xf32> -> vector<2x8x32xf32>
    "tpu.trace_stop"() : () -> ()
    %155 = arith.addf %129, %154 : vector<2x8x32xf32>
    %156 = vector.shape_cast %155 : vector<2x8x32xf32> to vector<16x32xf32>
    %157 = arith.addf %1, %156 : vector<16x32xf32>
    %c0_58 = arith.constant 0 : index
    %c0_59 = arith.constant 0 : index
    %158 = vector.load %arg7[%c0_58, %c0_59] : memref<1x32xf32, #tpu.memory_space<vmem>>, vector<1x32xf32>
    %159 = vector.broadcast %158 : vector<1x32xf32> to vector<16x32xf32>
    %160 = arith.addf %157, %159 : vector<16x32xf32>
    %cst_60 = arith.constant dense<0.000000e+00> : vector<16xf32>
    %161 = vector.multi_reduction <add>, %160, %cst_60 [1] : vector<16x32xf32> to vector<16xf32>
    %162 = vector.shape_cast %161 : vector<16xf32> to vector<16x1xf32>
    %cst_61 = arith.constant 3.200000e+01 : f32
    %163 = vector.broadcast %cst_61 : f32 to vector<16x1xf32>
    %164 = arith.divf %162, %163 : vector<16x1xf32>
    %165 = vector.broadcast %164 : vector<16x1xf32> to vector<16x32xf32>
    %166 = arith.subf %160, %165 : vector<16x32xf32>
    %167 = arith.mulf %166, %166 : vector<16x32xf32>
    %cst_62 = arith.constant dense<0.000000e+00> : vector<16xf32>
    %168 = vector.multi_reduction <add>, %167, %cst_62 [1] : vector<16x32xf32> to vector<16xf32>
    %169 = vector.shape_cast %168 : vector<16xf32> to vector<16x1xf32>
    %cst_63 = arith.constant 0.0322580636 : f32
    %170 = vector.broadcast %cst_63 : f32 to vector<16x1xf32>
    %171 = arith.mulf %169, %170 : vector<16x1xf32>
    %172 = vector.broadcast %164 : vector<16x1xf32> to vector<16x32xf32>
    %173 = arith.subf %160, %172 : vector<16x32xf32>
    %174 = math.sqrt %171 : vector<16x1xf32>
    %cst_64 = arith.constant 9.99999997E-7 : f32
    %175 = vector.broadcast %cst_64 : f32 to vector<16x1xf32>
    %176 = arith.addf %174, %175 : vector<16x1xf32>
    %177 = tpu.reciprocal %176 {approx = true} : vector<16x1xf32> -> vector<16x1xf32>
    %178 = arith.mulf %176, %177 : vector<16x1xf32>
    %cst_65 = arith.constant 2.000000e+00 : f32
    %179 = vector.broadcast %cst_65 : f32 to vector<16x1xf32>
    %180 = arith.subf %179, %178 : vector<16x1xf32>
    %181 = arith.mulf %177, %180 : vector<16x1xf32>
    %182 = vector.broadcast %181 : vector<16x1xf32> to vector<16x32xf32>
    %183 = arith.mulf %173, %182 : vector<16x32xf32>
    %184 = vector.broadcast %5 : vector<1x32xf32> to vector<16x32xf32>
    %185 = arith.mulf %183, %184 : vector<16x32xf32>
    %186 = vector.broadcast %6 : vector<1x32xf32> to vector<16x32xf32>
    %187 = arith.addf %185, %186 : vector<16x32xf32>
    %c0_66 = arith.constant 0 : index
    %c0_67 = arith.constant 0 : index
    %188 = vector.load %arg8[%c0_66, %c0_67] : memref<32x64xf32, #tpu.memory_space<vmem>>, vector<32x64xf32>
    %cst_68 = arith.constant dense<0.000000e+00> : vector<16x64xf32>
    %189 = tpu.matmul %187, %188, %cst_68 {dimension_numbers = #tpu.dot_dimension_numbers<[1], [0], [0], [1], [0, 0, 1, 1], [], []>} : vector<16x32xf32>, vector<32x64xf32>, vector<16x64xf32> -> vector<16x64xf32>
    %c0_69 = arith.constant 0 : index
    %c0_70 = arith.constant 0 : index
    %190 = vector.load %arg9[%c0_69, %c0_70] : memref<1x64xf32, #tpu.memory_space<vmem>>, vector<1x64xf32>
    %191 = vector.broadcast %190 : vector<1x64xf32> to vector<16x64xf32>
    %192 = arith.addf %189, %191 : vector<16x64xf32>
    %cst_71 = arith.constant 0.000000e+00 : f32
    %193 = vector.broadcast %cst_71 : f32 to vector<16x64xf32>
    %194 = arith.maximumf %192, %193 : vector<16x64xf32>
    %c0_72 = arith.constant 0 : index
    %c0_73 = arith.constant 0 : index
    %195 = vector.load %arg10[%c0_72, %c0_73] : memref<64x32xf32, #tpu.memory_space<vmem>>, vector<64x32xf32>
    %cst_74 = arith.constant dense<0.000000e+00> : vector<16x32xf32>
    %196 = tpu.matmul %194, %195, %cst_74 {dimension_numbers = #tpu.dot_dimension_numbers<[1], [0], [0], [1], [0, 0, 1, 1], [], []>} : vector<16x64xf32>, vector<64x32xf32>, vector<16x32xf32> -> vector<16x32xf32>
    %c0_75 = arith.constant 0 : index
    %c0_76 = arith.constant 0 : index
    %197 = vector.load %arg11[%c0_75, %c0_76] : memref<1x32xf32, #tpu.memory_space<vmem>>, vector<1x32xf32>
    %198 = vector.broadcast %197 : vector<1x32xf32> to vector<16x32xf32>
    %199 = arith.addf %196, %198 : vector<16x32xf32>
    %200 = arith.addf %160, %199 : vector<16x32xf32>
    %201 = vector.shape_cast %200 : vector<16x32xf32> to vector<2x8x32xf32>
    %c0_77 = arith.constant 0 : index
    %c0_78 = arith.constant 0 : index
    %c0_79 = arith.constant 0 : index
    %202 = vector.load %arg12[%c0_77, %c0_78, %c0_79] : memref<2x8x32xf32, #tpu.memory_space<vmem>>, vector<2x8x32xf32>
    tpu.vector_store %arg12[%c0_77, %c0_78, %c0_79], %201 {strides = array<i32>} : memref<2x8x32xf32, #tpu.memory_space<vmem>>, vector<2x8x32xf32>,
    return
  }
  func.func @transform_0(%arg0: i32) -> (i32, i32, i32) {
    %c0_i32 = arith.constant 0 : i32
    %c0_i32_0 = arith.constant 0 : i32
    %c0_i32_1 = arith.constant 0 : i32
    return %arg0, %c0_i32, %c0_i32_0 : i32, i32, i32
  }
  func.func @transform_1(%arg0: i32) -> (i32, i32, i32) {
    %c0_i32 = arith.constant 0 : i32
    %c0_i32_0 = arith.constant 0 : i32
    %c0_i32_1 = arith.constant 0 : i32
    return %arg0, %c0_i32, %c0_i32_0 : i32, i32, i32
  }
  func.func @transform_2(%arg0: i32) -> (i32, i32) {
    %c0_i32 = arith.constant 0 : i32
    %c0_i32_0 = arith.constant 0 : i32
    %c0_i32_1 = arith.constant 0 : i32
    return %c0_i32, %c0_i32_0 : i32, i32
  }
  func.func @transform_3(%arg0: i32) -> (i32, i32) {
    %c0_i32 = arith.constant 0 : i32
    %c0_i32_0 = arith.constant 0 : i32
    %c0_i32_1 = arith.constant 0 : i32
    return %c0_i32, %c0_i32_0 : i32, i32
  }
  func.func @transform_4(%arg0: i32) -> (i32, i32) {
    %c0_i32 = arith.constant 0 : i32
    %c0_i32_0 = arith.constant 0 : i32
    %c0_i32_1 = arith.constant 0 : i32
    return %c0_i32, %c0_i32_0 : i32, i32
  }
  func.func @transform_5(%arg0: i32) -> (i32, i32, i32) {
    %c0_i32 = arith.constant 0 : i32
    %c0_i32_0 = arith.constant 0 : i32
    %c0_i32_1 = arith.constant 0 : i32
    %c0_i32_2 = arith.constant 0 : i32
    return %c0_i32, %c0_i32_0, %c0_i32_1 : i32, i32, i32
  }
  func.func @transform_6(%arg0: i32) -> (i32, i32) {
    %c0_i32 = arith.constant 0 : i32
    %c0_i32_0 = arith.constant 0 : i32
    %c0_i32_1 = arith.constant 0 : i32
    return %c0_i32, %c0_i32_0 : i32, i32
  }
  func.func @transform_7(%arg0: i32) -> (i32, i32) {
    %c0_i32 = arith.constant 0 : i32
    %c0_i32_0 = arith.constant 0 : i32
    %c0_i32_1 = arith.constant 0 : i32
    return %c0_i32, %c0_i32_0 : i32, i32
  }
  func.func @transform_8(%arg0: i32) -> (i32, i32) {
    %c0_i32 = arith.constant 0 : i32
    %c0_i32_0 = arith.constant 0 : i32
    %c0_i32_1 = arith.constant 0 : i32
    return %c0_i32, %c0_i32_0 : i32, i32
  }
  func.func @transform_9(%arg0: i32) -> (i32, i32) {
    %c0_i32 = arith.constant 0 : i32
    %c0_i32_0 = arith.constant 0 : i32
    %c0_i32_1 = arith.constant 0 : i32
    return %c0_i32, %c0_i32_0 : i32, i32
  }
  func.func @transform_10(%arg0: i32) -> (i32, i32) {
    %c0_i32 = arith.constant 0 : i32
    %c0_i32_0 = arith.constant 0 : i32
    %c0_i32_1 = arith.constant 0 : i32
    return %c0_i32, %c0_i32_0 : i32, i32
  }
  func.func @transform_11(%arg0: i32) -> (i32, i32, i32) {
    %c0_i32 = arith.constant 0 : i32
    %c0_i32_0 = arith.constant 0 : i32
    %c0_i32_1 = arith.constant 0 : i32
    return %arg0, %c0_i32, %c0_i32_0 : i32, i32, i32
  }
}

</mosaic_0001>

<bundles_post_ra>
// kernel: tpu_custom_call.1
= control target key start
LH: loop header
LB: loop body
LE: loop exit
PB: predicated region body
PF: predicated region fallthrough
CT: control target
= control target key end

     0   :  { %s2319_s0 = inlined_call_operand.vmem [shape: f32[4,8,32], index: 0, kind: input, shape index: {}]   ;;  %s2320_s1 = inlined_call_operand.hbm [shape: f32[4,1,8], index: 1, kind: input, shape index: {}]   ;;  %s2321_s2 = inlined_call_operand.hbm [shape: f32[4,32], index: 2, kind: input, shape index: {}]   ;;  %s2322_s3 = inlined_call_operand.vmem [shape: f32[32,64], index: 3, kind: input, shape index: {}]   ;;  %s2323_s4 = inlined_call_operand.vmem [shape: f32[1,64], index: 4, kind: input, shape index: {}]   ;;  %s2324_s5 = inlined_call_operand.hbm [shape: f32[4,32,32], index: 5, kind: input, shape index: {}]   ;;  %s2325_s6 = inlined_call_operand.vmem [shape: f32[1,32], index: 6, kind: input, shape index: {}]   ;;  %s2326_s7 = inlined_call_operand.vmem [shape: f32[32,64], index: 7, kind: input, shape index: {}]   ;;  %s2327_s8 = inlined_call_operand.vmem [shape: f32[1,64], index: 8, kind: input, shape index: {}]   ;;  %s2328_s9 = inlined_call_operand.vmem [shape: f32[64,32], index: 9, kind: input, shape index: {}]   ;;  %s2329_s10 = inlined_call_operand.vmem [shape: f32[1,32], index: 10, kind: input, shape index: {}]   ;;  %s2330_s11 = inlined_call_operand.hbm [shape: f32[4,8,32], index: 11, kind: output, shape index: {}]  }
   0x1   :  { %2338 = sst [smem:[#allocation17_spill]] %s2321_s2 }
   0x2   :  { %2339 = sst [smem:[#allocation18_spill]] %s2324_s5 }
   0x3   :  { %2340 = sst [smem:[#allocation19_spill]] %s2329_s10 }
   0x4   :  { %2341 = sst [smem:[#allocation20_spill]] %s2330_s11 }
   0x5   :  { %16 = vsyncpa [#allocation3], 0 }
   0x6   :  { %18 = vsyncpa [#allocation3 + $0x1], 0 }
   0x7   :  { %19 = vsyncpa [#allocation6], 0 }
   0x8   :  { %20 = vsyncpa [#allocation4], 0 }
   0x9   :  { %22 = vsyncpa [#allocation4 + $0x1], 0  ;;  %s1941_s17 = smov 0   ;;  %s1943_s18 = smov 0  }
   0xa   :  { %s1945_s19 = smov 0   ;;  %s1947_s20 = smov 0  }
   0xb LB: > { %2342 = sst [smem:[#allocation12_spill]] %s1850_s17  ;;  %s1962_s21 = sadd.s32 4294967295, %s1862_s20   ;;  %s1862_s20 = sphi %s1947_s20, %s2361_s20   ;;  %s1858_s19 = sphi %s1945_s19, %s2365_s19   ;;  %s1854_s18 = sphi %s1943_s18, %s2364_s18   ;;  %s1850_s17 = sphi %s1941_s17, %s2363_s17  }
   0xc   : > { %s1508_s22 = sadd.s32 4294967294, %s1862_s20   ;;  %s1966_s23 = sadd.s32 1, %s1862_s20  }
   0xd   : > { %2343 = sst [smem:[#allocation13_spill]] %s1966_s23  ;;  %s61_s24 = sadd.s32 1, %s1858_s19 }
   0xe   : > { %s58_s25 = ssub.s32 %s1862_s20, %s1966_s23  ;;  %p68_p0 = scmp.ne.s32.totalorder %s1858_s19, %s1854_s18 }
   0xf   : > { %p59_p1 = scmp.eq.s32.totalorder %s58_s25, 0  ;;  %p69_p2 = scmp.eq.s32.totalorder %s1862_s20, 0 }
  0x10   : > { %p74_p3 = scmp.ne.s32.totalorder %s1854_s18, %s1850_s17  ;;  %p75_p4 = scmp.eq.s32.totalorder %s1962_s21, 0 }
  0x11   : > { %s1978_s26 = scalar_select %p59_p1, %s1858_s19, %s61_s24  }
  0x12   : > { %p1980_p5 = por %p69_p2, %p68_p0  ;;  %p1986_p6 = por %p75_p4, %p74_p3 }
  0x13   : > { %2344 = sst [smem:[#allocation14_spill]] %s1978_s26  ;;  %p287_p7 = scmp.eq.s32.totalorder %s1962_s21, 1 }
  0x14   : > { %p293_p8 = scmp.eq.s32.totalorder %s1508_s22, 1  ;;  %p1509_p9 = scmp.ge.s32.totalorder %s1862_s20, 1 }
  0x15   : > { %p300_p10 = scmp.lt.s32.totalorder %s1862_s20, 3  ;;  %p1993_p11 = por %p287_p7, %p68_p0 }
  0x16   : > { %p1997_p12 = por %p293_p8, %p74_p3  ;;  %s2352_s2 = sld [smem:[#allocation17_spill]] }
  0x17   : > { %s2347_s29 = scalar_select %p1993_p11, 1, 0 }
  0x18   : > { %s2349_s30 = scalar_select %p1997_p12, 1, 0 }
  0x19   : > { %2348 = sst [smem:[#allocation15_spill]] %s2347_s29  ;;  %p2001_p13 = pnand %p1509_p9, %p300_p10 }
  0x1a   : > { %2350 = sst [smem:[#allocation16_spill]] %s2349_s30  ;;  %s1864_s16 = smov [#allocation5]  }
  0x1b   : > { %p1578_p1 = pneg %p2001_p13  ;;  %s314_s22 = sshll.u32 %s1864_s16, 4  ;;  %s315_s22 = int_to_ptr.vmem [resolvable:$true] %s314_s22 }
  0x1c   : > { %s312_s15 = sshll.u32 %s2352_s2, 4  ;;  %p1595_p3 = scmp.lt.s32.totalorder %s1862_s20, 2  ;;  %s313_s15 = int_to_ptr.hbm [resolvable:$true] %s312_s15 }
  0x1d   : > { %p1579_p2 = pnand %p1578_p1, %p75_p4  ;;  %s2353_s5 = sld [smem:[#allocation18_spill]] }
  0x1e   : > { %p2019_p7 = pnand %p1595_p3, %p1980_p5  ;;  %s1865_s14 = smov [#allocation7]  }
  0x1f   : > { %1581 = dma.hbm_to_vmem [thread:$0]  (!%p1579_p2), %s313_s15, 64, %s315_s22, [#allocation6]  }
  0x20   : > { %s331_s2 = sshll.u32 %s1865_s14, 4  ;;  %s369_s16 = sand.u32 1, %s1858_s19   ;;  %s332_s2 = int_to_ptr.vmem [resolvable:$true] %s331_s2 }
  0x21   : > { %s1866_s23 = smov 128   ;;  %s1867_s30 = smov 8  }
  0x22   : > { %s1513_s17 = sshll.u32 %s369_s16, 1  ;;  %s1514_s11 = sshll.u32 %s1862_s20, 1 }
  0x23   : > { %s329_s26 = sshll.u32 %s2353_s5, 4  ;;  %s377_s25 = scalar_lea.hbm %s2320_s1, %s1514_s11  ;;  %s330_s26 = int_to_ptr.hbm [resolvable:$true] %s329_s26 }
  0x24   : > { %1584 = dma.hbm_to_vmem [thread:$0]  (!%p1579_p2), %s330_s26, 2048, %s332_s2, [#allocation6], %s1866_s23, %s1866_s23, %s1867_s30  }
  0x25   : > { %s373_s15 = scalar_lea.vmem [#allocation2], %s1513_s17  ;;  %s378_s22 = sshll.u32 %s377_s25, 4  ;;  %s379_s22 = int_to_ptr.hbm [resolvable:$true] %s378_s22 }
  0x26   : > { %s380_s27 = sshll.u32 %s373_s15, 4  ;;  %s370_s5 = scalar_lea.sflag [#allocation3], %s369_s16  ;;  %s381_s27 = int_to_ptr.vmem [resolvable:$true] %s380_s27 }
  0x27   : > { %s1762_s10 = sshra.s32 %s379_s22, 4  ;;  %p1766_p8 = pneg %p2019_p7  ;;  %s1763_s10 = int_to_ptr.hbm [resolvable:$true] %s1762_s10 }
  0x28   : > { %s1764_s14 = scalar_lea.hbm %s1763_s10, 2  ;;  %s1769_s26 = scalar_lea.hbm %s2320_s1, 4 }
  0x29   : > { %p1765_p5 = scmp.ne.s32.totalorder %s1763_s10, %s1764_s14  ;;  %p1770_p1 = scmp.lt.s32.totalorder %s1763_s10, %s2320_s1 }
  0x2a   : > { %p1771_p2 = scmp.lt.s32.totalorder %s1769_s26, %s1764_s14 }
  0x2b   : > { %p1767_p9 = pnand %p1766_p8, %p1765_p5 }
  0x2c   : > { %p1772_p3 = por %p1771_p2, %p1770_p1 }
  0x2d   : > { %p1768_p10 = pneg %p1767_p9 }
  0x2f   : > { %p1773_p0 = pnand %p1772_p3, %p1768_p10 }
  0x31   : > { %1776 = shalt.err (!%p1773_p0)
}
  0x32   : > { %s1868_s17 = smov 16   ;;  %s1869_s30 = smov 1  }
  0x33   : > { %1588 = dma.hbm_to_vmem [thread:$0]  (!%p2019_p7), %s379_s22, 32, %s381_s27, %s370_s5, %s1868_s17, %s1868_s17, %s1869_s30  }
  0x34   : > { %392 = sbr.rel (%p2001_p13) target bundleno = 2504 (0x9c8), region = 64  ;;  %s2041_s16 = sand.u32 (!%p2001_p13), 1, %s1854_s18  }
  0x35   : > { %s1516_s24 = sshll.u32 (!%p2001_p13), %s2041_s16, 1  ;;  %s395_s10 = scalar_lea.sflag (!%p2001_p13), [#allocation3], %s2041_s16 }
  0x36   : > { %s2045_s25 = scalar_lea.vmem (!%p2001_p13), [#allocation2], %s1516_s24 }
  0x39   : > { %1837 = dma.done.wait (%p1986_p6), %s395_s10, 32  }
  0x3a   : > { %1839 = vsyncadd (%p1986_p6), %s395_s10, 4294967264 }
  0x3b   : > { %1841 = dma.done.wait (%p75_p4), [#allocation6], 2112  }
  0x3c   : > { %1843 = vsyncadd (%p75_p4), [#allocation6], 4294965184  ;;  %s1520_s5 = sshll.u32 %s1962_s21, 1  ;;  %vm476_vm0 = vcmask 261120   ;;  %v1870_v4 = vmov 32.0   ;;  %v549_v21 = vld [vmem:[%s2322_s3 + $0x18] sm:$0xff] }
  0x3d   : > { %p454_p13 = scmp.lt.s32.totalorder %s1520_s5, 3  ;;  %1652 = vrcp.f32 %v1870_v4  ;;  %v548_v22 = vld [vmem:[%s2322_s3 + $0x10] sm:$0xff]  ;;  %572 = vmatpush.msra.mxu3 %v549_v21  ;;  %v547_v23 = vld [vmem:[%s2322_s3 + $0x8] sm:$0xff]  ;;  %v546_v25 = vld [vmem:[%s2322_s3] sm:$0xff]  ;;  %s1871_s24 = smov 96   ;;  %vm586_vm6 = vcmask 64512  }
  0x3e   : > { %v673_v40 = vld [vmem:[#allocation7 + $0x18] sm:$0xff]  ;;  %v672_v41 = vld [vmem:[#allocation7 + $0x10] sm:$0xff]  ;;  %v671_v45 = vld [vmem:[#allocation7 + $0x8] sm:$0xff]  ;;  %s1872_s10 = smov 120   ;;  %s1877_s13 = smov 104   ;;  %vm1354_vm11 = vcmask 523264  }
  0x3f   : > { %s2367_s5 = smov (!%p454_p13, %s1520_s5), 3  ;;  %573 = vmatpush.msra.mxu3 %v548_v22  ;;  %v670_v48 = vld [vmem:[#allocation7] sm:$0xff]  ;;  %v2095_v57 = vld [vmem:[#allocation5] sm:$0xf]  ;;  %v788_v21 = vld [vmem:[#allocation7 + $0x30] sm:$0xff]  ;;  %s1878_s15 = smov 72  }
  0x40   : > { %s1521_s12 = sshll.u32 %s2367_s5, 3  ;;  %v540_v60 = vperm.slane %v2095_v57, 0  ;;  %v543_v62 = vperm.slane %v2095_v57, 1  ;;  %s1873_s5 = smov 88   ;;  %v787_v22 = vld [vmem:[#allocation7 + $0x28] sm:$0xff] }
  0x41   : > { %s457_s27 = scalar_lea.vmem %s2319_s0, %s1521_s12  ;;  %574 = vmatpush.msra.mxu3 %v547_v23  ;;  %s1876_s12 = smov 112  }
  0x42   : > { %v2059_v0 = vld [vmem:[%s457_s27] sm:$0xff]  ;;  %v2063_v2 = vld [vmem:[%s457_s27 + $0x8] sm:$0xff]  ;;  %s2357_s28 = sld [smem:[#allocation20_spill]]  ;;  %s1389_s23 = scalar_lea.sflag [#allocation4], %s2041_s16 }
  0x43   : > { %v477_v1 = vsel %vm476_vm0, %v2059_v0, 0.0  ;;  %v480_v3 = vsel %vm476_vm0, %v2063_v2, 0.0  ;;  %v1653_v5 = vpop.eup %1652  ;;  %575 = vmatpush.msra.mxu3 %v546_v25  ;;  %v997_v25 = vld [vmem:[#allocation7 + $0x58] sm:$0xff] }
  0x44   : > { %478 = vadd.xlane.f32.xlu0 %v477_v1  ;;  %v484_v6 = vmul.f32 32.0, %v1653_v5  ;;  %vm488_vm1 = vweird.f32 %v1653_v5 }
  0x45   : > { %686 = vmatpush.msrb.mxu3 %v673_v40 }
  0x46   : > { %v485_v7 = vsub.f32 1.0, %v484_v6 }
  0x47   : > { %687 = vmatpush.msrb.mxu3 %v672_v41 }
  0x48   : > { %v486_v8 = vmul.f32 %v1653_v5, %v485_v7  ;;  %s1812_s17 = scalar_lea.hbm %s2357_s28, 32 }
  0x49   : > { %688 = vmatpush.msrb.mxu3 %v671_v45 }
  0x4a   : > { %v487_v9 = vadd.f32 %v1653_v5, %v486_v8 }
  0x4b   : > { %689 = vmatpush.msrb.mxu3 %v670_v48 }
  0x4c   : > { %481 = vadd.xlane.f32.xlu0 %v480_v3  ;;  %v2067_v10 = vsel %vm488_vm1, %v1653_v5, %v487_v9 }
  0xb7   : > { %v479_v11 = vpop.xlane.xlu0 %478 }
  0xb8   : > { %v490_v12 = vmul.f32 %v2067_v10, %v479_v11  ;;  %v1648_v11 = vld [vmem:[%s2323_s4] ss:$0 sm:$0xff] }
  0xba   : > { %v2071_v13 = vsub.f32 %v2059_v0, %v490_v12 }
  0xbc   : > { %v494_v14 = vmul.f32 %v2071_v13, %v2071_v13 }
  0xbe   : > { %v496_v15 = vsel %vm476_vm0, %v494_v14, 0.0 }
  0xbf   : > { %497 = vadd.xlane.f32.xlu1 %v496_v15  ;;  %v482_v16 = vpop.xlane.xlu0 %481 }
  0xc0   : > { %v491_v17 = vmul.f32 %v2067_v10, %v482_v16 }
  0xc2   : > { %v2078_v18 = vsub.f32 %v2063_v2, %v491_v17 }
  0xc4   : > { %v495_v19 = vmul.f32 %v2078_v18, %v2078_v18 }
  0xc6   : > { %v499_v20 = vsel %vm476_vm0, %v495_v19, 0.0 }
  0xc7   : > { %500 = vadd.xlane.f32.xlu1 %v499_v20  ;;  %v789_v20 = vld [vmem:[#allocation7 + $0x38] sm:$0xff] }
 0x132   : > { %v498_v24 = vpop.xlane.xlu1 %497 }
 0x133   : > { %v502_v26 = vmul.f32 0.032258064, %v498_v24  ;;  %v786_v24 = vld [vmem:[#allocation7 + $0x20] sm:$0xff] }
 0x135   : > { %1654 = vrsqrt.f32 %v502_v26  ;;  %vm511_vm2 = vcmp.eq.f32.partialorder %v502_v26, inf  ;;  %v514_v39 = vand.u32 2147483648, %v502_v26  ;;  %vm513_vm3 = vcmp.eq.f32.partialorder %v502_v26, 0.0 }
 0x13a   : > { %v501_v27 = vpop.xlane.xlu1 %500 }
 0x13b   : > { %v1655_v28 = vpop.eup %1654  ;;  %v503_v29 = vmul.f32 0.032258064, %v501_v27  ;;  %v996_v27 = vld [vmem:[#allocation7 + $0x50] sm:$0xff] }
 0x13c   : > { %v505_v30 = vmul.f32 %v1655_v28, %v502_v26 }
 0x13d   : > { %1656 = vrsqrt.f32 %v503_v29  ;;  %vm523_vm4 = vcmp.eq.f32.partialorder %v503_v29, inf  ;;  %v526_v51 = vand.u32 2147483648, %v503_v29  ;;  %vm525_vm5 = vcmp.eq.f32.partialorder %v503_v29, 0.0 }
 0x13e   : > { %v506_v31 = vmul.f32 %v1655_v28, %v505_v30  ;;  %v464_v30 = vld [vmem:[%s2045_s25] sm:$0x1] }
 0x13f   : > { %vm466_vm7 = vcmp.gt.f32.partialorder %v464_v30, 0.0 }
 0x140   : > { %v507_v32 = vmul.f32 0.5, %v506_v31  ;;  %v1874_v31 = vmov -1e+09  }
 0x142   : > { %v508_v33 = vsub.f32 1.5, %v507_v32  ;;  %v468_v32 = vsel %vm466_vm7, 0.0, %v1874_v31 }
 0x143   : > { %v1657_v34 = vpop.eup %1656 }
 0x144   : > { %v509_v35 = vmul.f32 %v1655_v28, %v508_v33  ;;  %v517_v36 = vmul.f32 %v1657_v34, %v503_v29  ;;  %v995_v28 = vld [vmem:[#allocation7 + $0x48] sm:$0xff]  ;;  %v2145_v33 = vperm.slane %v468_v32, 0 }
 0x146   : > { %v510_v37 = vmul.f32 %v509_v35, %v502_v26  ;;  %v518_v38 = vmul.f32 %v1657_v34, %v517_v36 }
 0x148   : > { %v519_v42 = vmul.f32 0.5, %v518_v38  ;;  %v512_v43 = vsel %vm511_vm2, %v502_v26, %v510_v37  ;;  %v465_v38 = vld [vmem:[%s2045_s25 + $0x1] sm:$0x1]  ;;  %s1875_s25 = smov 80  }
 0x149   : > { %v515_v44 = vsel %vm513_vm3, %v514_v39, %v512_v43  ;;  %vm467_vm8 = vcmp.gt.f32.partialorder %v465_v38, 0.0 }
 0x14a   : > { %v520_v46 = vsub.f32 1.5, %v519_v42  ;;  %v528_v47 = vadd.f32 1e-06, %v515_v44  ;;  %v469_v42 = vsel %vm467_vm8, 0.0, %v1874_v31 }
 0x14b   : > { %v2150_v45 = vperm.slane %v469_v42, 0 }
 0x14c   : > { %v521_v49 = vmul.f32 %v1657_v34, %v520_v46  ;;  %1658 = vrcp.f32 %v528_v47 }
 0x14e   : > { %v522_v50 = vmul.f32 %v521_v49, %v503_v29 }
 0x150   : > { %v524_v52 = vsel %vm523_vm4, %v503_v29, %v522_v50  ;;  %v994_v29 = vld [vmem:[#allocation7 + $0x40] sm:$0xff] }
 0x151   : > { %v527_v53 = vsel %vm525_vm5, %v526_v51, %v524_v52 }
 0x152   : > { %v1659_v54 = vpop.eup %1658  ;;  %v529_v55 = vadd.f32 1e-06, %v527_v53 }
 0x153   : > { %v532_v56 = vmul.f32 %v1659_v54, %v528_v47 }
 0x154   : > { %1660 = vrcp.f32 %v529_v55 }
 0x155   : > { %v534_v58 = vsub.f32 2.0, %v532_v56 }
 0x157   : > { %v536_v59 = vmul.f32 %v1659_v54, %v534_v58 }
 0x159   : > { %v538_v61 = vmul.f32 %v536_v59, %v2071_v13 }
 0x15a   : > { %v1661_v63 = vpop.eup %1660 }
 0x15b   : > { %v541_v1 = vmul.f32 %v540_v60, %v538_v61  ;;  %v533_v3 = vmul.f32 %v1661_v63, %v529_v55 }
 0x15d   : > { %v2100_v4 = vadd.f32 %v543_v62, %v541_v1  ;;  %v535_v5 = vsub.f32 2.0, %v533_v3 }
 0x15f   : > { %1522 = vmatmul.msk.f32.vlgmr.msra.gmra.mxu3 %vm476_vm0, %v2100_v4  ;;  %v537_v6 = vmul.f32 %v1661_v63, %v535_v5 }
 0x161   : > { %v539_v7 = vmul.f32 %v537_v6, %v2078_v18 }
 0x163   : > { %v542_v8 = vmul.f32 %v540_v60, %v539_v7 }
 0x165   : > { %v2105_v9 = vadd.f32 %v543_v62, %v542_v8 }
 0x167   : > { %1523 = vmatmul.msk.f32.gmra.mxu3 %vm476_vm0, %v2105_v9 }
 0x16f   : > { %1528 = vmatmul.msk.f32.vlgmr.msrb.gmra.mxu3 %vm476_vm0, %v2100_v4 }
 0x177   : > { %1529 = vmatmul.msk.f32.gmra.mxu3 %vm476_vm0, %v2105_v9 }
 0x1e2   : > { %v577_v12 = vpop.f32.mrf.mxu3 }
 0x1e3   : > { %v2116_v13 = vadd.f32 %v1648_v11, %v577_v12 }
 0x1e5   : > { %584 = vrot.lane.b32.xlu1 %v2116_v13, %s1871_s24 }
 0x1ea   : > { %v580_v14 = vpop.f32.mrf.mxu3 }
 0x1eb   : > { %v2119_v15 = vadd.f32 %v1648_v11, %v580_v14 }
 0x1ed   : > { %725 = vrot.lane.b32.xlu0 %v2119_v15, %s1872_s10  ;;  %612 = vrot.lane.b32.xlu2 %v2119_v15, %s1871_s24 }
 0x1f2   : > { %v691_v40 = vpop.f32.mrf.mxu3 }
 0x1f5   : > { %727 = vrot.lane.b32.xlu2 %v2119_v15, %s1873_s5 }
 0x1fa   : > { %v694_v49 = vpop.f32.mrf.mxu3 }
 0x1fd   : > { %699 = vrot.lane.b32.xlu2 %v2116_v13, %s1873_s5  ;;  %s1519_s5 = sshll.u32 %s2041_s16, 4 }
 0x205   : > { %697 = vrot.lane.b32.xlu2 %v2116_v13, %s1872_s10  ;;  %s2355_s10 = sld [smem:[#allocation19_spill]] }
 0x247   : > { %v613_v16 = vpop.permute.xlu2 %612 }
 0x248   : > { %1526 = vmatpush.xpose.msk.msra.mxu2 %vm586_vm6, %v613_v16 }
 0x24b   : > { %1527 = vmatmul.msk.f32.vlgmr.msra.gmra.mxu2 %vm586_vm6, %v2119_v15 }
 0x24f   : > { %v728_v17 = vpop.permute.xlu2 %727 }
 0x250   : > { %1532 = vmatpush.xpose.msk.msrb.mxu2 %vm586_vm6, %v728_v17 }
 0x257   : > { %v700_v18 = vpop.permute.xlu2 %699  ;;  %v585_v19 = vpop.permute.xlu1 %584 }
 0x258   : > { %1524 = vmatpush.xpose.msk.msra.mxu1 %vm586_vm6, %v585_v19 }
 0x25b   : > { %1525 = vmatmul.msk.f32.vlgmr.msra.gmra.mxu1 %vm586_vm6, %v2116_v13 }
 0x25c   : > { %1530 = vmatpush.xpose.msk.msrb.mxu1 %vm586_vm6, %v700_v18 }
 0x25f   : > { %v726_v23 = vpop.permute.xlu0 %725  ;;  %v698_v26 = vpop.permute.xlu2 %697 }
 0x260   : > { %802 = vmatpush.msra.mxu1 %v789_v20  ;;  %1533 = vmatmul.msk.f32.vlgmr.msrb.gmra.mxu2 %vm586_vm6, %v726_v23 }
 0x262   : > { %803 = vmatpush.msra.mxu1 %v788_v21 }
 0x263   : > { %1531 = vmatmul.msk.f32.vlgmr.msrb.gmra.mxu1 %vm586_vm6, %v698_v26 }
 0x264   : > { %804 = vmatpush.msra.mxu1 %v787_v22 }
 0x266   : > { %805 = vmatpush.msra.mxu1 %v786_v24 }
 0x268   : > { %1010 = vmatpush.msrb.mxu1 %v997_v25 }
 0x26a   : > { %1011 = vmatpush.msrb.mxu1 %v996_v27 }
 0x26b   : > { %1534 = vmatmul.msk.f32.vlgmr.msra.gmra.mxu1 %vm476_vm0, %v2100_v4 }
 0x26c   : > { %1012 = vmatpush.msrb.mxu1 %v995_v28 }
 0x26e   : > { %1013 = vmatpush.msrb.mxu1 %v994_v29 }
 0x273   : > { %1535 = vmatmul.msk.f32.gmra.mxu1 %vm476_vm0, %v2105_v9 }
 0x27b   : > { %1544 = vmatmul.msk.f32.vlgmr.msrb.gmra.mxu1 %vm476_vm0, %v2100_v4 }
 0x283   : > { %1545 = vmatmul.msk.f32.gmra.mxu1 %vm476_vm0, %v2105_v9 }
 0x2ce   : > { %v635_v36 = vpop.f32.mrf.mxu2 }
 0x2cf   : > { %v639_v51 = vmul.f32 0.35355338, %v635_v36 }
 0x2d1   : > { %v641_v52 = vadd.f32 %v639_v51, %v2150_v45 }
 0x2d3   : > { %v645_v53 = vsel %vm586_vm6, %v641_v52, -inf }
 0x2d8   : > { %v608_v34 = vpop.f32.mrf.mxu1 }
 0x2d9   : > { %v638_v35 = vmul.f32 0.35355338, %v608_v34 }
 0x2db   : > { %v640_v37 = vadd.f32 %v638_v35, %v2145_v33 }
 0x2dd   : > { %v642_v39 = vsel %vm586_vm6, %v640_v37, -inf }
 0x2de   : > { %643 = vmax.xlane.f32.xlu0 %v642_v39 }
 0x2e0   : > { %v722_v41 = vpop.f32.mrf.mxu1 }
 0x2e1   : > { %v753_v6 = vmul.f32 0.35355338, %v722_v41 }
 0x2e3   : > { %v750_v43 = vpop.f32.mrf.mxu2  ;;  %v755_v12 = vadd.f32 %v753_v6, %v2145_v33 }
 0x2e4   : > { %v754_v44 = vmul.f32 0.35355338, %v750_v43 }
 0x2e5   : > { %v757_v14 = vsel %vm586_vm6, %v755_v12, -inf }
 0x2e6   : > { %v756_v46 = vadd.f32 %v754_v44, %v2150_v45 }
 0x2e8   : > { %v807_v47 = vpop.f32.mrf.mxu1  ;;  %v760_v48 = vsel %vm586_vm6, %v756_v46, -inf }
 0x2e9   : > { %761 = vmax.xlane.f32.xlu2 %v760_v48  ;;  %831 = vmatpush.msra.mxu2 %v807_v47 }
 0x2eb   : > { %900 = vmatpush.msrb.mxu2 %v694_v49 }
 0x2f0   : > { %v810_v50 = vpop.f32.mrf.mxu1 }
 0x2f1   : > { %854 = vmatpush.msra.mxu0 %v810_v50 }
 0x2f2   : > { %907 = vrot.lane.b32.xlu0 %v2116_v13, %s1875_s25 }
 0x2f3   : > { %877 = vmatpush.msrb.mxu0 %v691_v40 }
 0x2f8   : > { %v1015_v26 = vpop.f32.mrf.mxu1 }
 0x2fa   : > { %933 = vrot.lane.b32.xlu0 %v2119_v15, %s1876_s12 }
 0x300   : > { %v1018_v31 = vpop.f32.mrf.mxu1 }
 0x324   : > { %646 = vmax.xlane.f32.xlu0 %v645_v53 }
 0x351   : > { %v644_v54 = vpop.xlane.xlu0 %643 }
 0x352   : > { %v648_v55 = vsub.f32 %v640_v37, %v644_v54 }
 0x354   : > { %v650_v56 = vmul.f32 1.442695, %v648_v55 }
 0x356   : > { %1662 = vpow2.f32 %v650_v56 }
 0x35c   : > { %v1663_v58 = vpop.eup %1662  ;;  %v762_v59 = vpop.xlane.xlu2 %761 }
 0x35d   : > { %v764_v60 = vsub.f32 %v756_v46, %v762_v59  ;;  %v654_v61 = vsel %vm586_vm6, %v1663_v58, 0.0 }
 0x35e   : > { %655 = vadd.xlane.f32.xlu2 %v654_v61 }
 0x35f   : > { %v767_v62 = vmul.f32 1.442695, %v764_v60 }
 0x361   : > { %1664 = vpow2.f32 %v767_v62 }
 0x364   : > { %v908_v3 = vpop.permute.xlu0 %907 }
 0x367   : > { %v1665_v63 = vpop.eup %1664 }
 0x368   : > { %v772_v1 = vsel %vm586_vm6, %v1665_v63, 0.0 }
 0x369   : > { %773 = vadd.xlane.f32.xlu1 %v772_v1 }
 0x36c   : > { %v934_v5 = vpop.permute.xlu0 %933 }
 0x376   : > { %905 = vrot.lane.b32.xlu2 %v2116_v13, %s1876_s12 }
 0x382   : > { %935 = vrot.lane.b32.xlu1 %v2119_v15, %s1875_s25  ;;  %s452_s25 = scalar_lea.vmem [#allocation8], %s1519_s5 }
 0x383   : > { %s1401_s14 = sshll.u32 %s452_s25, 4  ;;  %s1402_s14 = int_to_ptr.vmem [resolvable:$true] %s1401_s14 }
 0x397   : > { %v647_v7 = vpop.xlane.xlu0 %646 }
 0x398   : > { %v649_v8 = vsub.f32 %v641_v52, %v647_v7 }
 0x39a   : > { %v652_v11 = vmul.f32 1.442695, %v649_v8 }
 0x39c   : > { %1666 = vpow2.f32 %v652_v11 }
 0x39f   : > { %758 = vmax.xlane.f32.xlu2 %v757_v14 }
 0x3a2   : > { %v2164_v16 = vpop.eup %1666 }
 0x3a3   : > { %v657_v17 = vsel %vm586_vm6, %v2164_v16, 0.0 }
 0x3a4   : > { %658 = vadd.xlane.f32.xlu0 %v657_v17 }
 0x3b8   : > { %1069 = vrot.lane.b32.xlu0 %v2116_v13, %s1877_s13 }
 0x3c0   : > { %1097 = vrot.lane.b32.xlu0 %v2119_v15, %s1877_s13  ;;  %s1565_s13 = sshll.u32 %s1962_s21, 4 }
 0x3c1   : > { %s1400_s22 = scalar_lea.hbm %s2357_s28, %s1565_s13 }
 0x3c2   : > { %s1403_s2 = sshll.u32 %s1400_s22, 4  ;;  %s1404_s2 = int_to_ptr.hbm [resolvable:$true] %s1403_s2 }
 0x3c3   : > { %s1806_s26 = sshra.s32 %s1404_s2, 4  ;;  %s1807_s26 = int_to_ptr.hbm [resolvable:$true] %s1806_s26 }
 0x3c4   : > { %s1808_s29 = scalar_lea.hbm %s1807_s26, 16  ;;  %p1813_p7 = scmp.lt.s32.totalorder %s1807_s26, %s2357_s28 }
 0x3c5   : > { %p1809_p4 = scmp.ne.s32.totalorder %s1807_s26, %s1808_s29  ;;  %p1814_p5 = scmp.lt.s32.totalorder %s1812_s17, %s1808_s29 }
 0x3c7   : > { %p1810_p6 = pnand %p1809_p4, %p1993_p11  ;;  %p1815_p8 = por %p1814_p5, %p1813_p7 }
 0x3c9   : > { %p1811_p0 = pneg %p1810_p6 }
 0x3cb   : > { %p1816_p9 = pnand %p1815_p8, %p1811_p0 }
 0x3d1   : > { %v656_v18 = vpop.xlane.xlu2 %655 }
 0x3d2   : > { %1668 = vrcp.f32 %v656_v18 }
 0x3d8   : > { %v1669_v20 = vpop.eup %1668 }
 0x3d9   : > { %v662_v23 = vmul.f32 %v1669_v20, %v656_v18  ;;  %v906_v34 = vpop.permute.xlu2 %905 }
 0x3db   : > { %v664_v27 = vsub.f32 2.0, %v662_v23 }
 0x3dc   : > { %v774_v19 = vpop.xlane.xlu1 %773 }
 0x3dd   : > { %1670 = vrcp.f32 %v774_v19  ;;  %v666_v29 = vmul.f32 %v1669_v20, %v664_v27 }
 0x3df   : > { %v668_v30 = vmul.f32 %v1663_v58, %v666_v29 }
 0x3e3   : > { %v1671_v21 = vpop.eup %1670 }
 0x3e4   : > { %v778_v22 = vmul.f32 %v1671_v21, %v774_v19 }
 0x3e6   : > { %v780_v24 = vsub.f32 2.0, %v778_v22 }
 0x3e8   : > { %v782_v25 = vmul.f32 %v1671_v21, %v780_v24 }
 0x3ea   : > { %v784_v28 = vmul.f32 %v1665_v63, %v782_v25 }
 0x3ec   : > { %1537 = vmatmul.msk.f32.vlgmr.msra.gmra.mxu0 %vm586_vm6, %v784_v28 }
 0x3ed   : > { %1540 = vmatpush.xpose.msk.msra.mxu0 %vm586_vm6, %v908_v3 }
 0x3f4   : > { %1538 = vmatmul.msk.f32.vlgmr.msrb.gmra.mxu0 %vm586_vm6, %v668_v30  ;;  %v936_v32 = vpop.permute.xlu1 %935 }
 0x3f5   : > { %1062 = vmatpush.msrb.mxu0 %v1018_v31  ;;  %1542 = vmatpush.xpose.msk.msra.mxu3 %vm586_vm6, %v936_v32  ;;  %v1161_v32 = vld [vmem:[#allocation7 + $0x78] sm:$0xff] }
 0x3f8   : > { %1543 = vmatmul.msk.f32.vlgmr.msra.gmra.mxu3 %vm586_vm6, %v934_v5 }
 0x3fc   : > { %1541 = vmatmul.msk.f32.vlgmr.msra.gmra.mxu0 %vm586_vm6, %v906_v34  ;;  %v1160_v34 = vld [vmem:[#allocation7 + $0x70] sm:$0xff] }
 0x3fd   : > { %1174 = vmatpush.msra.mxu0 %v1161_v32 }
 0x3ff   : > { %1175 = vmatpush.msra.mxu0 %v1160_v34 }
 0x412   : > { %v759_v35 = vpop.xlane.xlu2 %758 }
 0x413   : > { %v763_v36 = vsub.f32 %v755_v12, %v759_v35 }
 0x415   : > { %v765_v37 = vmul.f32 1.442695, %v763_v36  ;;  %v1159_v36 = vld [vmem:[#allocation7 + $0x68] sm:$0xff] }
 0x416   : > { %1176 = vmatpush.msra.mxu0 %v1159_v36 }
 0x417   : > { %1672 = vpow2.f32 %v765_v37  ;;  %v659_v51 = vpop.xlane.xlu0 %658  ;;  %v1158_v37 = vld [vmem:[#allocation7 + $0x60] sm:$0xff] }
 0x418   : > { %1674 = vrcp.f32 %v659_v51  ;;  %1177 = vmatpush.msra.mxu0 %v1158_v37 }
 0x41d   : > { %v1673_v38 = vpop.eup %1672 }
 0x41e   : > { %v769_v39 = vsel %vm586_vm6, %v1673_v38, 0.0  ;;  %v1675_v52 = vpop.eup %1674 }
 0x41f   : > { %770 = vadd.xlane.f32.xlu2 %v769_v39  ;;  %v663_v56 = vmul.f32 %v1675_v52, %v659_v51 }
 0x421   : > { %v665_v61 = vsub.f32 2.0, %v663_v56 }
 0x423   : > { %v667_v63 = vmul.f32 %v1675_v52, %v665_v61 }
 0x425   : > { %v669_v1 = vmul.f32 %v2164_v16, %v667_v63 }
 0x42a   : > { %v1070_v59 = vpop.permute.xlu0 %1069 }
 0x432   : > { %v1098_v27 = vpop.permute.xlu0 %1097 }
 0x437   : > { %1071 = vrot.lane.b32.xlu2 %v2116_v13, %s1878_s15 }
 0x469   : > { %v2179_v40 = vpop.f32.mrf.mxu0 }
 0x471   : > { %v2181_v41 = vpop.f32.mrf.mxu0 }
 0x479   : > { %v930_v42 = vpop.f32.mrf.mxu0 }
 0x47a   : > { %v961_v43 = vmul.f32 0.35355338, %v930_v42 }
 0x47b   : > { %v958_v44 = vpop.f32.mrf.mxu3 }
 0x47c   : > { %v962_v46 = vmul.f32 0.35355338, %v958_v44  ;;  %v963_v47 = vadd.f32 %v961_v43, %v2145_v33 }
 0x47e   : > { %v965_v48 = vsel %vm586_vm6, %v963_v47, -inf  ;;  %v964_v49 = vadd.f32 %v962_v46, %v2150_v45 }
 0x47f   : > { %966 = vmax.xlane.f32.xlu1 %v965_v48 }
 0x480   : > { %v968_v50 = vsel %vm586_vm6, %v964_v49, -inf }
 0x481   : > { %969 = vmax.xlane.f32.xlu2 %v968_v50 }
 0x492   : > { %v771_v13 = vpop.xlane.xlu2 %770 }
 0x493   : > { %1676 = vrcp.f32 %v771_v13 }
 0x499   : > { %v1677_v53 = vpop.eup %1676 }
 0x49a   : > { %v777_v54 = vmul.f32 %v1677_v53, %v771_v13  ;;  %v1072_v55 = vpop.permute.xlu2 %1071 }
 0x49b   : > { %1548 = vmatpush.xpose.msk.msrb.mxu3 %vm586_vm6, %v1072_v55 }
 0x49c   : > { %v779_v58 = vsub.f32 2.0, %v777_v54 }
 0x49e   : > { %v781_v60 = vmul.f32 %v1677_v53, %v779_v58  ;;  %1549 = vmatmul.msk.f32.vlgmr.msrb.gmra.mxu3 %vm586_vm6, %v1070_v59 }
 0x4a0   : > { %v783_v62 = vmul.f32 %v1673_v38, %v781_v60 }
 0x4a2   : > { %1536 = vmatmul.msk.f32.vlgmr.msra.gmra.mxu2 %vm586_vm6, %v783_v62 }
 0x4a3   : > { %1039 = vmatpush.msra.mxu2 %v1015_v26 }
 0x4aa   : > { %1539 = vmatmul.msk.f32.vlgmr.msrb.gmra.mxu2 %vm586_vm6, %v669_v1 }
 0x4f2   : > { %v967_v3 = vpop.xlane.xlu1 %966 }
 0x4f3   : > { %v971_v5 = vsub.f32 %v963_v47, %v967_v3 }
 0x4f4   : > { %v970_v16 = vpop.xlane.xlu2 %969 }
 0x4f5   : > { %v973_v6 = vmul.f32 1.442695, %v971_v5  ;;  %v972_v18 = vsub.f32 %v964_v49, %v970_v16 }
 0x4f7   : > { %1678 = vpow2.f32 %v973_v6  ;;  %v975_v19 = vmul.f32 1.442695, %v972_v18 }
 0x4f9   : > { %1680 = vpow2.f32 %v975_v19 }
 0x4fd   : > { %v1679_v7 = vpop.eup %1678 }
 0x4fe   : > { %v977_v8 = vsel %vm586_vm6, %v1679_v7, 0.0 }
 0x4ff   : > { %978 = vadd.xlane.f32.xlu1 %v977_v8  ;;  %v1681_v20 = vpop.eup %1680 }
 0x500   : > { %v980_v21 = vsel %vm586_vm6, %v1681_v20, 0.0 }
 0x518   : > { %1099 = vrot.lane.b32.xlu1 %v2119_v15, %s1878_s15 }
 0x521   : > { %v1094_v11 = vpop.f32.mrf.mxu3 }
 0x522   : > { %v1125_v12 = vmul.f32 0.35355338, %v1094_v11 }
 0x524   : > { %v1127_v14 = vadd.f32 %v1125_v12, %v2145_v33 }
 0x525   : > { %v833_v47 = vpop.f32.mrf.mxu2 }
 0x526   : > { %v1129_v17 = vsel %vm586_vm6, %v1127_v14, -inf  ;;  %v880_v49 = vadd.f32 %v2181_v41, %v833_v47 }
 0x527   : > { %1130 = vmax.xlane.f32.xlu0 %v1129_v17 }
 0x52d   : > { %v902_v48 = vpop.f32.mrf.mxu2 }
 0x542   : > { %981 = vadd.xlane.f32.xlu1 %v980_v21 }
 0x572   : > { %v979_v22 = vpop.xlane.xlu1 %978 }
 0x573   : > { %1682 = vrcp.f32 %v979_v22 }
 0x579   : > { %v1683_v23 = vpop.eup %1682 }
 0x57a   : > { %v985_v24 = vmul.f32 %v1683_v23, %v979_v22 }
 0x57c   : > { %v987_v15 = vsub.f32 2.0, %v985_v24 }
 0x57e   : > { %v989_v25 = vmul.f32 %v1683_v23, %v987_v15  ;;  %v903_v15 = vadd.f32 %v902_v48, %v2179_v40  ;;  %v1304_v40 = vld [vmem:[%s2326_s7 + $0x8] sm:$0xff] }
 0x580   : > { %v991_v26 = vmul.f32 %v1679_v7, %v989_v25  ;;  %v1649_v7 = vld [vmem:[%s2325_s6] ss:$0 sm:$0xff] }
 0x582   : > { %1546 = vmatmul.msk.f32.vlgmr.msra.gmra.mxu2 %vm586_vm6, %v991_v26 }
 0x58a   : > { %v1100_v33 = vpop.permute.xlu1 %1099 }
 0x58b   : > { %1550 = vmatpush.xpose.msk.msrb.mxu2 %vm586_vm6, %v1100_v33 }
 0x58e   : > { %1551 = vmatmul.msk.f32.vlgmr.msrb.gmra.mxu2 %vm586_vm6, %v1098_v27 }
 0x59a   : > { %v1131_v28 = vpop.xlane.xlu0 %1130 }
 0x59b   : > { %v1135_v29 = vsub.f32 %v1127_v14, %v1131_v28 }
 0x59d   : > { %v1137_v30 = vmul.f32 1.442695, %v1135_v29 }
 0x59f   : > { %1684 = vpow2.f32 %v1137_v30  ;;  %v1306_v30 = vld [vmem:[%s2326_s7 + $0x18] sm:$0xff] }
 0x5a0   : > { %1329 = vmatpush.msra.mxu2 %v1306_v30 }
 0x5a5   : > { %v1685_v31 = vpop.eup %1684 }
 0x5a6   : > { %v1141_v35 = vsel %vm586_vm6, %v1685_v31, 0.0 }
 0x5a7   : > { %1142 = vadd.xlane.f32.xlu1 %v1141_v35 }
 0x5b5   : > { %v982_v38 = vpop.xlane.xlu1 %981 }
 0x5b6   : > { %1686 = vrcp.f32 %v982_v38 }
 0x5bc   : > { %v1687_v39 = vpop.eup %1686 }
 0x5bd   : > { %v986_v42 = vmul.f32 %v1687_v39, %v982_v38 }
 0x5bf   : > { %v988_v43 = vsub.f32 2.0, %v986_v42 }
 0x5c1   : > { %v990_v44 = vmul.f32 %v1687_v39, %v988_v43 }
 0x5c3   : > { %v992_v46 = vmul.f32 %v1681_v20, %v990_v44 }
 0x5c5   : > { %1547 = vmatmul.msk.f32.vlgmr.msrb.gmra.mxu0 %vm586_vm6, %v992_v46 }
 0x5cd   : > { %1552 = vmatmul.msk.f32.vlgmr.msra.gmra.mxu0 %vm476_vm0, %v2100_v4 }
 0x5d5   : > { %1553 = vmatmul.msk.f32.gmra.mxu0 %vm476_vm0, %v2105_v9 }
 0x605   : > { %v1041_v50 = vpop.f32.mrf.mxu2 }
 0x606   : > { %v1067_v51 = vadd.f32 %v1041_v50, %v880_v49 }
 0x611   : > { %v1122_v13 = vpop.f32.mrf.mxu2 }
 0x612   : > { %v1126_v52 = vmul.f32 0.35355338, %v1122_v13 }
 0x614   : > { %v1128_v53 = vadd.f32 %v1126_v52, %v2150_v45  ;;  %v1297_v52 = vperm.slane %v2095_v57, 2 }
 0x616   : > { %v1132_v54 = vsel %vm586_vm6, %v1128_v53, -inf }
 0x617   : > { %1133 = vmax.xlane.f32.xlu2 %v1132_v54  ;;  %v1300_v54 = vperm.slane %v2095_v57, 3  ;;  %v1346_v57 = vld [vmem:[%s2328_s9 + $0x20] sm:$0xff] }
 0x61a   : > { %v1143_v55 = vpop.xlane.xlu1 %1142 }
 0x61b   : > { %1688 = vrcp.f32 %v1143_v55 }
 0x621   : > { %v1689_v56 = vpop.eup %1688 }
 0x622   : > { %v1149_v4 = vmul.f32 %v1689_v56, %v1143_v55 }
 0x624   : > { %v1151_v58 = vsub.f32 2.0, %v1149_v4  ;;  %v1349_v4 = vld [vmem:[%s2328_s9 + $0x38] sm:$0xff] }
 0x625   : > { %1369 = vmatpush.msrb.mxu0 %v1349_v4 }
 0x626   : > { %v1153_v9 = vmul.f32 %v1689_v56, %v1151_v58  ;;  %v1348_v58 = vld [vmem:[%s2328_s9 + $0x30] sm:$0xff] }
 0x627   : > { %1370 = vmatpush.msrb.mxu0 %v1348_v58 }
 0x628   : > { %v1155_v60 = vmul.f32 %v1685_v31, %v1153_v9  ;;  %v1305_v31 = vld [vmem:[%s2326_s7 + $0x10] sm:$0xff]  ;;  %v1345_v9 = vld [vmem:[%s2328_s9 + $0x18] sm:$0xff] }
 0x629   : > { %1330 = vmatpush.msra.mxu2 %v1305_v31  ;;  %v1651_v31 = vld [vmem:[%s2355_s10] ss:$0 sm:$0xff] }
 0x62b   : > { %1331 = vmatpush.msra.mxu2 %v1304_v40 }
 0x642   : > { %v1064_v59 = vpop.f32.mrf.mxu0 }
 0x643   : > { %v1068_v25 = vadd.f32 %v1064_v59, %v903_v15  ;;  %v1347_v59 = vld [vmem:[%s2328_s9 + $0x28] sm:$0xff] }
 0x644   : > { %1371 = vmatpush.msrb.mxu0 %v1347_v59 }
 0x646   : > { %1372 = vmatpush.msrb.mxu0 %v1346_v57 }
 0x648   : > { %1373 = vmatpush.msrb.mxu0 %v1345_v9 }
 0x64a   : > { %v1179_v61 = vpop.f32.mrf.mxu0 }
 0x64b   : > { %1203 = vmatpush.msra.mxu3 %v1179_v61 }
 0x64c   : > { %1554 = vmatmul.msk.f32.vlgmr.msra.gmra.mxu3 %vm586_vm6, %v1155_v60 }
 0x652   : > { %v1182_v41 = vpop.f32.mrf.mxu0 }
 0x653   : > { %1226 = vmatpush.msra.mxu1 %v1182_v41 }
 0x68a   : > { %v1134_v62 = vpop.xlane.xlu2 %1133 }
 0x68b   : > { %v1136_v63 = vsub.f32 %v1128_v53, %v1134_v62 }
 0x68d   : > { %v1139_v45 = vmul.f32 1.442695, %v1136_v63 }
 0x68f   : > { %1690 = vpow2.f32 %v1139_v45  ;;  %v1344_v45 = vld [vmem:[%s2328_s9 + $0x10] sm:$0xff] }
 0x690   : > { %1374 = vmatpush.msrb.mxu0 %v1344_v45 }
 0x695   : > { %v1691_v1 = vpop.eup %1690 }
 0x696   : > { %v1144_v3 = vsel %vm586_vm6, %v1691_v1, 0.0 }
 0x697   : > { %1145 = vadd.xlane.f32.xlu0 %v1144_v3  ;;  %v1650_v3 = vld [vmem:[%s2327_s8] ss:$0 sm:$0xff] }
 0x6cf   : > { %v1205_v5 = vpop.f32.mrf.mxu3 }
 0x6d0   : > { %v1231_v6 = vadd.f32 %v1205_v5, %v1067_v51 }
 0x6d2   : > { %v1233_v8 = vadd.f32 %v1231_v6, %v2059_v0 }
 0x6d4   : > { %v2216_v11 = vadd.f32 %v1649_v7, %v1233_v8 }
 0x6d6   : > { %v1241_v12 = vsel %vm476_vm0, %v2216_v11, 0.0 }
 0x6d7   : > { %1242 = vadd.xlane.f32.xlu2 %v1241_v12 }
 0x70a   : > { %v1146_v14 = vpop.xlane.xlu0 %1145 }
 0x70b   : > { %1692 = vrcp.f32 %v1146_v14 }
 0x711   : > { %v1693_v17 = vpop.eup %1692 }
 0x712   : > { %v1150_v16 = vmul.f32 %v1693_v17, %v1146_v14 }
 0x714   : > { %v1152_v18 = vsub.f32 2.0, %v1150_v16 }
 0x716   : > { %v1154_v19 = vmul.f32 %v1693_v17, %v1152_v18 }
 0x718   : > { %v1156_v20 = vmul.f32 %v1691_v1, %v1154_v19  ;;  %v1343_v1 = vld [vmem:[%s2328_s9 + $0x8] sm:$0xff] }
 0x719   : > { %1375 = vmatpush.msrb.mxu0 %v1343_v1 }
 0x71a   : > { %1555 = vmatmul.msk.f32.vlgmr.msra.gmra.mxu1 %vm586_vm6, %v1156_v20 }
 0x74a   : > { %v1243_v21 = vpop.xlane.xlu2 %1242 }
 0x74b   : > { %v1247_v22 = vmul.f32 %v1243_v21, %v2067_v10 }
 0x74d   : > { %v1249_v0 = vsub.f32 %v2216_v11, %v1247_v22 }
 0x74f   : > { %v1251_v23 = vmul.f32 %v1249_v0, %v1249_v0 }
 0x751   : > { %v1253_v24 = vsel %vm476_vm0, %v1251_v23, 0.0 }
 0x752   : > { %1254 = vadd.xlane.f32.xlu0 %v1253_v24 }
 0x797   : > { %v1228_v26 = vpop.f32.mrf.mxu1 }
 0x798   : > { %v1232_v33 = vadd.f32 %v1228_v26, %v1068_v25 }
 0x79a   : > { %v1234_v27 = vadd.f32 %v1232_v33, %v2063_v2  ;;  %v1303_v2 = vld [vmem:[%s2326_s7] sm:$0xff] }
 0x79b   : > { %1332 = vmatpush.msra.mxu2 %v1303_v2 }
 0x79c   : > { %v2226_v28 = vadd.f32 %v1649_v7, %v1234_v27 }
 0x79e   : > { %v1244_v29 = vsel %vm476_vm0, %v2226_v28, 0.0 }
 0x79f   : > { %1245 = vadd.xlane.f32.xlu1 %v1244_v29 }
 0x7c5   : > { %v1255_v32 = vpop.xlane.xlu0 %1254 }
 0x7c6   : > { %v1259_v34 = vmul.f32 0.032258064, %v1255_v32 }
 0x7c8   : > { %1694 = vrsqrt.f32 %v1259_v34  ;;  %vm1268_vm9 = vcmp.eq.f32.partialorder %v1259_v34, inf  ;;  %v1271_v44 = vand.u32 2147483648, %v1259_v34  ;;  %vm1270_vm10 = vcmp.eq.f32.partialorder %v1259_v34, 0.0 }
 0x7ce   : > { %v1695_v35 = vpop.eup %1694 }
 0x7cf   : > { %v1262_v36 = vmul.f32 %v1695_v35, %v1259_v34 }
 0x7d1   : > { %v1263_v37 = vmul.f32 %v1695_v35, %v1262_v36 }
 0x7d3   : > { %v1264_v38 = vmul.f32 0.5, %v1263_v37 }
 0x7d5   : > { %v1265_v39 = vsub.f32 1.5, %v1264_v38 }
 0x7d7   : > { %v1266_v42 = vmul.f32 %v1695_v35, %v1265_v39 }
 0x7d9   : > { %v1267_v43 = vmul.f32 %v1266_v42, %v1259_v34 }
 0x7db   : > { %v1269_v46 = vsel %vm1268_vm9, %v1259_v34, %v1267_v43 }
 0x7dc   : > { %v1272_v47 = vsel %vm1270_vm10, %v1271_v44, %v1269_v46 }
 0x7dd   : > { %v1285_v48 = vadd.f32 1e-06, %v1272_v47 }
 0x7df   : > { %1696 = vrcp.f32 %v1285_v48 }
 0x7e5   : > { %v1697_v49 = vpop.eup %1696 }
 0x7e6   : > { %v1289_v50 = vmul.f32 %v1697_v49, %v1285_v48 }
 0x7e8   : > { %v1291_v51 = vsub.f32 2.0, %v1289_v50 }
 0x7ea   : > { %v1293_v13 = vmul.f32 %v1697_v49, %v1291_v51 }
 0x7ec   : > { %v1295_v53 = vmul.f32 %v1293_v13, %v1249_v0 }
 0x7ee   : > { %v1298_v55 = vmul.f32 %v1297_v52, %v1295_v53 }
 0x7f0   : > { %v1301_v56 = vadd.f32 %v1300_v54, %v1298_v55 }
 0x7f2   : > { %1556 = vmatmul.msk.f32.vlgmr.msra.gmra.mxu2 %vm476_vm0, %v1301_v56 }
 0x812   : > { %v1246_v60 = vpop.xlane.xlu1 %1245 }
 0x813   : > { %v1248_v61 = vmul.f32 %v1246_v60, %v2067_v10  ;;  %v1342_v10 = vld [vmem:[%s2328_s9] sm:$0xff] }
 0x814   : > { %1376 = vmatpush.msrb.mxu0 %v1342_v10 }
 0x815   : > { %v1250_v41 = vsub.f32 %v2226_v28, %v1248_v61 }
 0x817   : > { %v1252_v62 = vmul.f32 %v1250_v41, %v1250_v41 }
 0x819   : > { %v1256_v63 = vsel %vm476_vm0, %v1252_v62, 0.0 }
 0x81a   : > { %1257 = vadd.xlane.f32.xlu2 %v1256_v63 }
 0x875   : > { %v1334_v5 = vpop.f32.mrf.mxu2 }
 0x876   : > { %v1335_v6 = vadd.f32 %v1650_v3, %v1334_v5 }
 0x878   : > { %v1340_v7 = vmax.f32 %v1335_v6, 0.0 }
 0x87a   : > { %1558 = vmatmul.msk.f32.vlgmr.msrb.gmra.mxu0 %vm1354_vm11, %v1340_v7 }
 0x88d   : > { %v1258_v8 = vpop.xlane.xlu2 %1257 }
 0x88e   : > { %v1260_v12 = vmul.f32 0.032258064, %v1258_v8 }
 0x890   : > { %1698 = vrsqrt.f32 %v1260_v12  ;;  %vm1280_vm12 = vcmp.eq.f32.partialorder %v1260_v12, inf  ;;  %v1283_v22 = vand.u32 2147483648, %v1260_v12  ;;  %vm1282_vm13 = vcmp.eq.f32.partialorder %v1260_v12, 0.0 }
 0x896   : > { %v1699_v14 = vpop.eup %1698 }
 0x897   : > { %v1274_v17 = vmul.f32 %v1699_v14, %v1260_v12 }
 0x899   : > { %v1275_v16 = vmul.f32 %v1699_v14, %v1274_v17 }
 0x89b   : > { %v1276_v18 = vmul.f32 0.5, %v1275_v16 }
 0x89d   : > { %v1277_v19 = vsub.f32 1.5, %v1276_v18 }
 0x89f   : > { %v1278_v20 = vmul.f32 %v1699_v14, %v1277_v19 }
 0x8a1   : > { %v1279_v21 = vmul.f32 %v1278_v20, %v1260_v12 }
 0x8a3   : > { %v1281_v0 = vsel %vm1280_vm12, %v1260_v12, %v1279_v21 }
 0x8a4   : > { %v1284_v23 = vsel %vm1282_vm13, %v1283_v22, %v1281_v0 }
 0x8a5   : > { %v1286_v24 = vadd.f32 1e-06, %v1284_v23 }
 0x8a7   : > { %1700 = vrcp.f32 %v1286_v24 }
 0x8ad   : > { %v1701_v15 = vpop.eup %1700 }
 0x8ae   : > { %v1290_v25 = vmul.f32 %v1701_v15, %v1286_v24 }
 0x8b0   : > { %v1292_v26 = vsub.f32 2.0, %v1290_v25 }
 0x8b2   : > { %v1294_v33 = vmul.f32 %v1701_v15, %v1292_v26 }
 0x8b4   : > { %v1296_v27 = vmul.f32 %v1294_v33, %v1250_v41 }
 0x8b6   : > { %v1299_v29 = vmul.f32 %v1297_v52, %v1296_v27 }
 0x8b8   : > { %v1302_v30 = vadd.f32 %v1300_v54, %v1299_v29 }
 0x8ba   : > { %1557 = vmatmul.msk.f32.gmra.mxu2 %vm476_vm0, %v1302_v30 }
 0x8f7   : > { %v1378_v40 = vpop.f32.mrf.mxu0 }
 0x8f8   : > { %v1379_v2 = vadd.f32 %v1651_v31, %v1378_v40 }
 0x8fa   : > { %v1384_v32 = vadd.f32 %v1379_v2, %v2216_v11 }
 0x8fc   : > { %1386 = vst.msk [vmem:[%s452_s25] sm:$0xff] %vm476_vm0, %v1384_v32 }
 0x93d   : > { %v1337_v34 = vpop.f32.mrf.mxu2 }
 0x93e   : > { %v1338_v35 = vadd.f32 %v1650_v3, %v1337_v34 }
 0x940   : > { %v1341_v36 = vmax.f32 %v1338_v35, 0.0 }
 0x942   : > { %1559 = vmatmul.msk.f32.gmra.mxu0 %vm1354_vm11, %v1341_v36 }
 0x9bf   : > { %v1381_v37 = vpop.f32.mrf.mxu0 }
 0x9c0   : > { %v1382_v38 = vadd.f32 %v1651_v31, %v1381_v37 }
 0x9c2   : > { %v1385_v11 = vadd.f32 %v1382_v38, %v2226_v28 }
 0x9c4   : > { %1387 = vst.msk [vmem:[%s452_s25 + $0x8] sm:$0xff] %vm476_vm0, %v1385_v11 }
 0x9c5   : > { %1819 = shalt.err (!%p1816_p9)
}
 0x9c6   : > { %s1879_s16 = smov 128   ;;  %s1880_s10 = smov 8  }
 0x9c7   : > { %1576 = dma.vmem_to_hbm [thread:$0]  (%p1993_p11), %s1402_s14, 256, %s1404_s2, %s1389_s23, %s1879_s16, %s1879_s16, %s1880_s10  }
 0x9c8 PF: > { %s2358_s5 = sld [smem:[#allocation12_spill]]  ;;  %p2360_p10 = scmp.ge.s32.totalorder %s1862_s20, 2 }
 0x9ca   : > { %p1590_p1 = pnand %p2360_p10, %p1997_p12 }
 0x9cc   : > { %p1591_p2 = pneg %p1590_p1 }
 0x9ce   : > { %s1418_s13 = sand.u32 1, %s2358_s5  }
 0x9cf   : > { %s1419_s15 = scalar_lea.sflag [#allocation4], %s1418_s13 }
 0x9d0   : > { %1845 = dma.done.wait (%p1591_p2), %s1419_s15, 256  }
 0x9d1   : > { %1847 = vsyncadd (%p1591_p2), %s1419_s15, 4294967040  ;;  %s2361_s20 = sld [smem:[#allocation13_spill]]  ;;  %s2363_s17 = smov %s1854_s18 }
 0x9d2   : > { %s2362_s27 = sld [smem:[#allocation14_spill]]  ;;  %s2364_s18 = smov %s1858_s19 }
 0x9d7   : > { %p25_p3 = scmp.ge.s32.totalorder %s2361_s20, 4  }
 0x9d8   : > { %s2365_s19 = smov %s2362_s27 }
 0x9d9   :  { %27 = sbr.rel (!%p25_p3) target bundleno = 11 (0xb), region = 123 }
 0x9de   :  { %1425 = vsyncpa [#allocation3], 1 }
 0x9df   :  { %1427 = vsyncpa [#allocation3 + $0x1], 1 }
 0x9e0   :  { %1428 = vsyncpa [#allocation6], 1 }
 0x9e1   :  { %1429 = vsyncpa [#allocation4], 1 }
 0x9e2   :  { %1431 = vsyncpa [#allocation4 + $0x1], 1 }

</bundles_post_ra>
